<compile_context>
chip_gen: v6e
topology: v6e:2x2x1
jax: 0.10.0
libtpu: 0.0.40
codegen_flags: <defaults>
</compile_context>

<pallas_src>
import functools

import jax
import jax.numpy as jnp
from jax.experimental import pallas as pl
from jax.experimental.pallas import tpu as pltpu


# --------------------------------------------------------------------------- #
# Kernel
# --------------------------------------------------------------------------- #
def _attn_kernel(q_ref, k_ref, v_ref, mask_ref, wq_ref, wk_ref, wv_ref,
                 out_ref, attn_ref, *, n_head, d_k, d_v, inv_temperature,
                 compute_dtype):
    gblk, L, d_model = q_ref.shape
    bh = gblk * n_head
    cd = compute_dtype

    # Fold (group, head) into one leading batch dim.  Only leading-dim
    # broadcasts / reshapes are used (minor two dims untouched), so no
    # in-kernel transposes or lane-offset slices are needed.
    def bcast_heads(x):                       # (G, L, D) -> (G*H, L, D)
        return jnp.broadcast_to(
            x[:, None], (gblk, n_head, L, x.shape[-1])).reshape(
                bh, L, x.shape[-1])

    def bcast_groups(w_ref):                  # (H, D, E) -> (G*H, D, E)
        w = w_ref[...].astype(cd)
        return jnp.broadcast_to(
            w[None], (gblk,) + w.shape).reshape(bh, w.shape[1], w.shape[2])

    q = bcast_heads(q_ref[...].astype(cd))
    k = bcast_heads(k_ref[...].astype(cd))
    v = bcast_heads(v_ref[...].astype(cd))

    wq = bcast_groups(wq_ref)
    wk = bcast_groups(wk_ref)
    wv = bcast_groups(wv_ref)

    # Per-(group, head) projections: one batched MXU contraction per tensor
    # (bf16 operands, f32 accumulation).
    qh = jnp.einsum('bld,bde->ble', q, wq,
                    preferred_element_type=jnp.float32).astype(cd)
    kh = jnp.einsum('bld,bde->ble', k, wk,
                    preferred_element_type=jnp.float32).astype(cd)
    vh = jnp.einsum('bld,bde->ble', v, wv,
                    preferred_element_type=jnp.float32).astype(cd)

    # scores = Q K^T / temperature, masked_fill(-1e9), softmax - all heads at
    # once in a single batched contraction.
    scores = jnp.einsum('bld,bmd->blm', qh, kh,
                        preferred_element_type=jnp.float32) * inv_temperature
    masked = jnp.broadcast_to(
        (mask_ref[...] != 0)[:, None], (gblk, n_head, L, L)).reshape(bh, L, L)
    scores = jnp.where(masked, jnp.float32(-1000000000.0), scores)

    scores = scores - jnp.max(scores, axis=-1, keepdims=True)
    e = jnp.exp(scores)
    # Exact reciprocal (not approx): the probabilities are a *returned* output
    # and should sum to 1 per row; only L values per row go through the EUP.
    attn = e * pl.reciprocal(jnp.sum(e, axis=-1, keepdims=True))

    # Single store of the attention probabilities for all heads.
    attn_ref[...] = attn.reshape(gblk, n_head, L, L).astype(attn_ref.dtype)

    # context = attn @ V (bf16 operands, f32 accumulation).
    ctx = jnp.einsum('blm,bmd->bld', attn.astype(cd), vh,
                     preferred_element_type=jnp.float32)
    ctx = ctx.reshape(gblk, n_head, L, d_v)

    # Lane-dense (G, L, n_head*d_v) output.  The head<->seq reorder between
    # the two module outputs has to happen somewhere; doing it here on the
    # narrow ctx tensor (n_head static slice-stores) avoids a wrapper-side HBM
    # transpose round trip.
    for h in range(n_head):
        out_ref[:, :, h * d_v:(h + 1) * d_v] = ctx[:, h].astype(out_ref.dtype)


# --------------------------------------------------------------------------- #
# Sizing helpers
# --------------------------------------------------------------------------- #
def _tpu_vmem_bytes():
    """Physical VMEM per TensorCore (conservative 64 MiB fallback == v7x)."""
    phys = 64 * 1024 * 1024
    try:
        info = pltpu.get_tpu_info()
        for name in ("vmem_capacity_bytes", "vmem_size_bytes", "vmem_bytes"):
            val = getattr(info, name, None)
            if isinstance(val, int) and val > 0:
                phys = val
                break
    except Exception:
        pass
    return phys


def _tpu_num_cores():
    """TensorCores sharing the grid (1 on v5e/v6e; 2 on v7x if exposed)."""
    try:
        dev = jax.devices()[0]
        for name in ("num_cores", "core_count"):
            val = getattr(dev, name, None)
            if isinstance(val, int) and val > 0:
                return val
    except Exception:
        pass
    return 1


def _estimate_step_vmem(gblk, L, d_model, n_head, d_k, d_v,
                        in_bytes, attn_bytes, compute_bytes):
    """Rough per-grid-step VMEM footprint (pipeline buffers + intermediates)."""
    f32 = 4
    bh = gblk * n_head
    w_cols = 2 * d_k + d_v
    pipelined = 2 * (3 * gblk * L * d_model * in_bytes        # q, k, v tiles
                     + gblk * L * L                            # int8 mask tile
                     + gblk * L * n_head * d_v * in_bytes      # ctx output tile
                     + bh * L * L * attn_bytes                 # attn output tile
                     + n_head * d_model * w_cols * f32)        # weight tiles
    scratch = (3 * bh * L * d_model * compute_bytes            # head-broadcast q/k/v
               + bh * d_model * w_cols * compute_bytes         # group-broadcast weights
               + bh * L * w_cols * (f32 + compute_bytes)       # projections
               + 3 * bh * L * L * f32                          # scores / exp / probs
               + bh * L * d_v * f32)                           # context
    return pipelined + scratch


def _pick_group_block(G, L, d_model, n_head, d_k, d_v,
                      in_bytes, attn_bytes, compute_bytes,
                      vmem_budget, num_cores):
    # ~256 projection rows per step; on multi-TC parts keep >= 2 steps per core
    # so BlockSpec double-buffering reaches steady state.  On 1-TC chips the
    # grid is a serial loop, so prefer the largest block that fits VMEM.
    cap = max(1, min(G, max(1, 256 // max(L, 1))))
    if num_cores >= 2 and G >= 2 * num_cores:
        cap = min(cap, max(1, G // (2 * num_cores)))
    for cand in range(cap, 0, -1):
        if G % cand:
            continue
        if _estimate_step_vmem(cand, L, d_model, n_head, d_k, d_v,
                               in_bytes, attn_bytes, compute_bytes) <= vmem_budget:
            return cand
    return 1


# --------------------------------------------------------------------------- #
# Wrapper
# --------------------------------------------------------------------------- #
def scaled_dot_product_attention_bias(q, k, v, mask, w_qs, w_ks, w_vs, *,
                                      n_head, d_k, d_v, temperature,
                                      attn_dropout=0.2,
                                      compute_dtype=jnp.bfloat16,
                                      attn_dtype=jnp.bfloat16,
                                      group_block=None):
    """q/k/v: (B, K, L, d_model); mask: (B, K, L, L) bool (True == masked).

    w_qs/w_ks/w_vs: PyTorch nn.Linear weights, shape (n_head*d, d_model).
    Matmuls run with bf16 operands / f32 accumulation by default
    (compute_dtype=jnp.float32 restores full f32 numerics).  attn_dtype
    controls the dtype of the returned attention probabilities (bf16 halves
    the dominant L^2-scaled HBM write; use jnp.float32 for exact PyTorch
    output dtype).  attn_dropout is ignored (eval-mode identity).
    """
    del attn_dropout  # TODO(synk): training-mode dropout via pltpu PRNG.

    B, K, L, d_model = q.shape
    G = B * K

    qf = q.reshape(G, L, d_model)
    kf = k.reshape(G, L, d_model)
    vf = v.reshape(G, L, d_model)
    maskf = mask.reshape(G, L, L).astype(jnp.int8)   # narrow mask end-to-end

    # Per-head weight stacks (n_head, d_model, d_k/d_v); one-time XLA reshape.
    wq_h = w_qs.reshape(n_head, d_k, d_model).transpose(0, 2, 1)
    wk_h = w_ks.reshape(n_head, d_k, d_model).transpose(0, 2, 1)
    wv_h = w_vs.reshape(n_head, d_v, d_model).transpose(0, 2, 1)

    in_bytes = jnp.dtype(q.dtype).itemsize
    attn_bytes = jnp.dtype(attn_dtype).itemsize
    compute_bytes = jnp.dtype(compute_dtype).itemsize

    phys_vmem = _tpu_vmem_bytes()
    vmem_limit = min(int(phys_vmem * 0.9), 128 * 1024 * 1024)
    vmem_budget = int(vmem_limit * 0.7)                 # headroom for estimate fuzz
    num_cores = _tpu_num_cores()

    if group_block is None:
        group_block = _pick_group_block(
            G, L, d_model, n_head, d_k, d_v,
            in_bytes, attn_bytes, compute_bytes, vmem_budget, num_cores)
    Gblk = group_block
    num_steps = G // Gblk

    kernel = functools.partial(
        _attn_kernel, n_head=n_head, d_k=d_k, d_v=d_v,
        inv_temperature=float(1.0 / temperature), compute_dtype=compute_dtype)

    out_f, attn_f = pl.pallas_call(
        kernel,
        out_shape=(
            jax.ShapeDtypeStruct((G, L, n_head * d_v), q.dtype),   # lane-dense ctx
            jax.ShapeDtypeStruct((G, n_head, L, L), attn_dtype),   # attention probs
        ),
        grid=(num_steps,),
        in_specs=[
            pl.BlockSpec((Gblk, L, d_model), lambda g: (g, 0, 0)),          # q
            pl.BlockSpec((Gblk, L, d_model), lambda g: (g, 0, 0)),          # k
            pl.BlockSpec((Gblk, L, d_model), lambda g: (g, 0, 0)),          # v
            pl.BlockSpec((Gblk, L, L), lambda g: (g, 0, 0)),                # mask
            pl.BlockSpec((n_head, d_model, d_k), lambda g: (0, 0, 0)),      # wq (resident)
            pl.BlockSpec((n_head, d_model, d_k), lambda g: (0, 0, 0)),      # wk (resident)
            pl.BlockSpec((n_head, d_model, d_v), lambda g: (0, 0, 0)),      # wv (resident)
        ],
        out_specs=(
            pl.BlockSpec((Gblk, L, n_head * d_v), lambda g: (g, 0, 0)),
            pl.BlockSpec((Gblk, n_head, L, L), lambda g: (g, 0, 0, 0)),
        ),
        compiler_params=pltpu.CompilerParams(
            dimension_semantics=("parallel",),
            vmem_limit_bytes=vmem_limit),
    )(qf, kf, vf, maskf, wq_h, wk_h, wv_h)

    # Free reshapes only (no transposes).
    out = out_f.reshape(B, K, L, n_head * d_v)
    attn = attn_f.reshape(B, K, n_head, L, L)
    return out, attn


# --------------------------------------------------------------------------- #
# Self-test
# --------------------------------------------------------------------------- #
if __name__ == "__main__":
    B, K, L = 2, 3, 8          # batch, num "sets" (k axis), sequence length
    d_model = 16
    n_head, d_k, d_v = 2, 8, 8
    temperature = d_k ** 0.5

    key = jax.random.PRNGKey(0)
    kq, kk, kv, kwq, kwk, kwv, kmask = jax.random.split(key, 7)

    q = jax.random.normal(kq, (B, K, L, d_model), dtype=jnp.float32)
    k = jax.random.normal(kk, (B, K, L, d_model), dtype=jnp.float32)
    v = jax.random.normal(kv, (B, K, L, d_model), dtype=jnp.float32)

    # PyTorch Linear layout: (out_features, in_features).
    w_qs = jax.random.normal(kwq, (n_head * d_k, d_model), dtype=jnp.float32) * 0.1
    w_ks = jax.random.normal(kwk, (n_head * d_k, d_model), dtype=jnp.float32) * 0.1
    w_vs = jax.random.normal(kwv, (n_head * d_v, d_model), dtype=jnp.float32) * 0.1

    # Boolean mask (True == masked out), shape (B, K, L, L); avoid fully-masked rows.
    mask = jax.random.bernoulli(kmask, p=0.2, shape=(B, K, L, L))
    mask = mask.at[..., 0].set(False)

    out, attn = scaled_dot_product_attention_bias(
        q, k, v, mask, w_qs, w_ks, w_vs,
        n_head=n_head, d_k=d_k, d_v=d_v, temperature=temperature)
    jax.block_until_ready((out, attn))

    # Pure-JAX f32 reference (mirrors the PyTorch module).
    def ref(q, k, v, mask):
        qp = (q @ w_qs.T).reshape(B, K, L, n_head, d_k).transpose(0, 1, 3, 2, 4)
        kp = (k @ w_ks.T).reshape(B, K, L, n_head, d_k).transpose(0, 1, 3, 4, 2)
        vp = (v @ w_vs.T).reshape(B, K, L, n_head, d_v).transpose(0, 1, 3, 2, 4)
        a = jnp.matmul(qp, kp) / temperature
        a = jnp.where(mask[:, :, None, :, :], -1e9, a)
        a = jax.nn.softmax(a, axis=-1)
        o = jnp.matmul(a, vp)
        o = o.transpose(0, 1, 3, 2, 4).reshape(B, K, L, n_head * d_v)
        return o, a

    o_ref, a_ref = ref(q, k, v, mask)
    assert out.shape == (B, K, L, n_head * d_v)
    assert attn.shape == (B, K, n_head, L, L)
    # Tolerance accounts for bf16 MXU operands (f32 accumulation) and the bf16
    # attention-probability output against the f32 reference.
    assert jnp.allclose(out, o_ref, atol=2e-2, rtol=2e-2)
    assert jnp.allclose(attn.astype(jnp.float32), a_ref, atol=2e-2, rtol=2e-2)

    print("KERNEL_OK")
</pallas_src>

<mosaic_0001>
module attributes {stable_mosaic.version = 11 : i64} {
  func.func @_attn_kernel(%arg0: i32, %arg1: memref<6x8x16xf32, #tpu.memory_space<vmem>>, %arg2: memref<6x8x16xf32, #tpu.memory_space<vmem>>, %arg3: memref<6x8x16xf32, #tpu.memory_space<vmem>>, %arg4: memref<6x8x8xi8, #tpu.memory_space<vmem>>, %arg5: memref<2x16x8xf32, #tpu.memory_space<vmem>>, %arg6: memref<2x16x8xf32, #tpu.memory_space<vmem>>, %arg7: memref<2x16x8xf32, #tpu.memory_space<vmem>>, %arg8: memref<6x8x16xf32, #tpu.memory_space<vmem>>, %arg9: memref<6x2x8x8xbf16, #tpu.memory_space<vmem>>) attributes {dimension_semantics = [#tpu.dimension_semantics<parallel>], iteration_bounds = array<i64: 1>, scalar_prefetch = 0 : i64, scratch_operands = 0 : i64, tpu.core_type = #tpu.core_type<tc>, window_params = [{transform_indices = @transform_0, window_bounds = array<i64: 6, 8, 16>}, {transform_indices = @transform_1, window_bounds = array<i64: 6, 8, 16>}, {transform_indices = @transform_2, window_bounds = array<i64: 6, 8, 16>}, {transform_indices = @transform_3, window_bounds = array<i64: 6, 8, 8>}, {pipeline_mode = #tpu.pipeline_mode<synchronous>, transform_indices = @transform_4, window_bounds = array<i64: 2, 16, 8>}, {pipeline_mode = #tpu.pipeline_mode<synchronous>, transform_indices = @transform_5, window_bounds = array<i64: 2, 16, 8>}, {pipeline_mode = #tpu.pipeline_mode<synchronous>, transform_indices = @transform_6, window_bounds = array<i64: 2, 16, 8>}, {transform_indices = @transform_7, window_bounds = array<i64: 6, 8, 16>}, {transform_indices = @transform_8, window_bounds = array<i64: 6, 2, 8, 8>}]} {
    %c0 = arith.constant 0 : index
    %c0_0 = arith.constant 0 : index
    %c0_1 = arith.constant 0 : index
    %0 = vector.load %arg1[%c0, %c0_0, %c0_1] : memref<6x8x16xf32, #tpu.memory_space<vmem>>, vector<6x8x16xf32>
    %1 = arith.truncf %0 : vector<6x8x16xf32> to vector<6x8x16xbf16>
    %2 = vector.shape_cast %1 : vector<6x8x16xbf16> to vector<6x1x8x16xbf16>
    %3 = vector.shape_cast %2 : vector<6x1x8x16xbf16> to vector<6x1x8x16xbf16>
    %4 = vector.broadcast %3 : vector<6x1x8x16xbf16> to vector<6x2x8x16xbf16>
    %5 = vector.shape_cast %4 : vector<6x2x8x16xbf16> to vector<12x8x16xbf16>
    %c0_2 = arith.constant 0 : index
    %c0_3 = arith.constant 0 : index
    %c0_4 = arith.constant 0 : index
    %6 = vector.load %arg2[%c0_2, %c0_3, %c0_4] : memref<6x8x16xf32, #tpu.memory_space<vmem>>, vector<6x8x16xf32>
    %7 = arith.truncf %6 : vector<6x8x16xf32> to vector<6x8x16xbf16>
    %8 = vector.shape_cast %7 : vector<6x8x16xbf16> to vector<6x1x8x16xbf16>
    %9 = vector.shape_cast %8 : vector<6x1x8x16xbf16> to vector<6x1x8x16xbf16>
    %10 = vector.broadcast %9 : vector<6x1x8x16xbf16> to vector<6x2x8x16xbf16>
    %11 = vector.shape_cast %10 : vector<6x2x8x16xbf16> to vector<12x8x16xbf16>
    %c0_5 = arith.constant 0 : index
    %c0_6 = arith.constant 0 : index
    %c0_7 = arith.constant 0 : index
    %12 = vector.load %arg3[%c0_5, %c0_6, %c0_7] : memref<6x8x16xf32, #tpu.memory_space<vmem>>, vector<6x8x16xf32>
    %13 = arith.truncf %12 : vector<6x8x16xf32> to vector<6x8x16xbf16>
    %14 = vector.shape_cast %13 : vector<6x8x16xbf16> to vector<6x1x8x16xbf16>
    %15 = vector.shape_cast %14 : vector<6x1x8x16xbf16> to vector<6x1x8x16xbf16>
    %16 = vector.broadcast %15 : vector<6x1x8x16xbf16> to vector<6x2x8x16xbf16>
    %17 = vector.shape_cast %16 : vector<6x2x8x16xbf16> to vector<12x8x16xbf16>
    %c0_8 = arith.constant 0 : index
    %c0_9 = arith.constant 0 : index
    %c0_10 = arith.constant 0 : index
    %18 = vector.load %arg5[%c0_8, %c0_9, %c0_10] : memref<2x16x8xf32, #tpu.memory_space<vmem>>, vector<2x16x8xf32>
    %19 = arith.truncf %18 : vector<2x16x8xf32> to vector<2x16x8xbf16>
    %20 = vector.shape_cast %19 : vector<2x16x8xbf16> to vector<1x2x16x8xbf16>
    %21 = vector.shape_cast %20 : vector<1x2x16x8xbf16> to vector<1x2x16x8xbf16>
    %22 = vector.broadcast %21 : vector<1x2x16x8xbf16> to vector<6x2x16x8xbf16>
    %23 = vector.shape_cast %22 : vector<6x2x16x8xbf16> to vector<12x16x8xbf16>
    %c0_11 = arith.constant 0 : index
    %c0_12 = arith.constant 0 : index
    %c0_13 = arith.constant 0 : index
    %24 = vector.load %arg6[%c0_11, %c0_12, %c0_13] : memref<2x16x8xf32, #tpu.memory_space<vmem>>, vector<2x16x8xf32>
    %25 = arith.truncf %24 : vector<2x16x8xf32> to vector<2x16x8xbf16>
    %26 = vector.shape_cast %25 : vector<2x16x8xbf16> to vector<1x2x16x8xbf16>
    %27 = vector.shape_cast %26 : vector<1x2x16x8xbf16> to vector<1x2x16x8xbf16>
    %28 = vector.broadcast %27 : vector<1x2x16x8xbf16> to vector<6x2x16x8xbf16>
    %29 = vector.shape_cast %28 : vector<6x2x16x8xbf16> to vector<12x16x8xbf16>
    %c0_14 = arith.constant 0 : index
    %c0_15 = arith.constant 0 : index
    %c0_16 = arith.constant 0 : index
    %30 = vector.load %arg7[%c0_14, %c0_15, %c0_16] : memref<2x16x8xf32, #tpu.memory_space<vmem>>, vector<2x16x8xf32>
    %31 = arith.truncf %30 : vector<2x16x8xf32> to vector<2x16x8xbf16>
    %32 = vector.shape_cast %31 : vector<2x16x8xbf16> to vector<1x2x16x8xbf16>
    %33 = vector.shape_cast %32 : vector<1x2x16x8xbf16> to vector<1x2x16x8xbf16>
    %34 = vector.broadcast %33 : vector<1x2x16x8xbf16> to vector<6x2x16x8xbf16>
    %35 = vector.shape_cast %34 : vector<6x2x16x8xbf16> to vector<12x16x8xbf16>
    "tpu.trace_start"() <{level = 10 : i32, message = "bld,bde->ble"}> : () -> ()
    %cst = arith.constant dense<0.000000e+00> : vector<12x8x8xf32>
    %36 = tpu.matmul %5, %23, %cst {dimension_numbers = #tpu.dot_dimension_numbers<[2], [1], [1], [2], [0, 0, 0, 1, 1, 2], [0], [0]>} : vector<12x8x16xbf16>, vector<12x16x8xbf16>, vector<12x8x8xf32> -> vector<12x8x8xf32>
    "tpu.trace_stop"() : () -> ()
    %37 = arith.truncf %36 : vector<12x8x8xf32> to vector<12x8x8xbf16>
    "tpu.trace_start"() <{level = 10 : i32, message = "bld,bde->ble"}> : () -> ()
    %cst_17 = arith.constant dense<0.000000e+00> : vector<12x8x8xf32>
    %38 = tpu.matmul %11, %29, %cst_17 {dimension_numbers = #tpu.dot_dimension_numbers<[2], [1], [1], [2], [0, 0, 0, 1, 1, 2], [0], [0]>} : vector<12x8x16xbf16>, vector<12x16x8xbf16>, vector<12x8x8xf32> -> vector<12x8x8xf32>
    "tpu.trace_stop"() : () -> ()
    %39 = arith.truncf %38 : vector<12x8x8xf32> to vector<12x8x8xbf16>
    "tpu.trace_start"() <{level = 10 : i32, message = "bld,bde->ble"}> : () -> ()
    %cst_18 = arith.constant dense<0.000000e+00> : vector<12x8x8xf32>
    %40 = tpu.matmul %17, %35, %cst_18 {dimension_numbers = #tpu.dot_dimension_numbers<[2], [1], [1], [2], [0, 0, 0, 1, 1, 2], [0], [0]>} : vector<12x8x16xbf16>, vector<12x16x8xbf16>, vector<12x8x8xf32> -> vector<12x8x8xf32>
    "tpu.trace_stop"() : () -> ()
    %41 = arith.truncf %40 : vector<12x8x8xf32> to vector<12x8x8xbf16>
    "tpu.trace_start"() <{level = 10 : i32, message = "bld,bmd->blm"}> : () -> ()
    %cst_19 = arith.constant dense<0.000000e+00> : vector<12x8x8xf32>
    %42 = tpu.matmul %37, %39, %cst_19 {dimension_numbers = #tpu.dot_dimension_numbers<[2], [2], [1], [1], [0, 0, 0, 1, 1, 1], [0], [0]>} : vector<12x8x8xbf16>, vector<12x8x8xbf16>, vector<12x8x8xf32> -> vector<12x8x8xf32>
    "tpu.trace_stop"() : () -> ()
    %cst_20 = arith.constant 0.353553385 : f32
    %43 = vector.broadcast %cst_20 : f32 to vector<12x8x8xf32>
    %44 = arith.mulf %42, %43 : vector<12x8x8xf32>
    %c0_21 = arith.constant 0 : index
    %c0_22 = arith.constant 0 : index
    %c0_23 = arith.constant 0 : index
    %45 = vector.load %arg4[%c0_21, %c0_22, %c0_23] : memref<6x8x8xi8, #tpu.memory_space<vmem>>, vector<6x8x8xi8>
    %c0_i8 = arith.constant 0 : i8
    %46 = vector.broadcast %c0_i8 : i8 to vector<6x8x8xi8>
    %47 = arith.cmpi ne, %45, %46 : vector<6x8x8xi8>
    %48 = vector.shape_cast %47 : vector<6x8x8xi1> to vector<6x1x8x8xi1>
    %49 = vector.shape_cast %48 : vector<6x1x8x8xi1> to vector<6x1x8x8xi1>
    %50 = vector.broadcast %49 : vector<6x1x8x8xi1> to vector<6x2x8x8xi1>
    %51 = vector.shape_cast %50 : vector<6x2x8x8xi1> to vector<12x8x8xi1>
    %cst_24 = arith.constant -1.000000e+09 : f32
    %52 = vector.broadcast %cst_24 : f32 to vector<12x8x8xf32>
    %53 = arith.select %51, %52, %44 : vector<12x8x8xi1>, vector<12x8x8xf32>
    %cst_25 = arith.constant dense<0xFF800000> : vector<12x8xf32>
    %54 = vector.multi_reduction <maximumf>, %53, %cst_25 [2] : vector<12x8x8xf32> to vector<12x8xf32>
    %55 = vector.shape_cast %54 : vector<12x8xf32> to vector<12x8x1xf32>
    %56 = vector.broadcast %55 : vector<12x8x1xf32> to vector<12x8x8xf32>
    %57 = arith.subf %53, %56 : vector<12x8x8xf32>
    %58 = math.exp %57 : vector<12x8x8xf32>
    %cst_26 = arith.constant dense<0.000000e+00> : vector<12x8xf32>
    %59 = vector.multi_reduction <add>, %58, %cst_26 [2] : vector<12x8x8xf32> to vector<12x8xf32>
    %60 = vector.shape_cast %59 : vector<12x8xf32> to vector<12x8x1xf32>
    %61 = tpu.reciprocal %60 : vector<12x8x1xf32> -> vector<12x8x1xf32>
    %62 = vector.broadcast %61 : vector<12x8x1xf32> to vector<12x8x8xf32>
    %63 = arith.mulf %58, %62 : vector<12x8x8xf32>
    %64 = vector.shape_cast %63 : vector<12x8x8xf32> to vector<6x2x8x8xf32>
    %65 = arith.truncf %64 : vector<6x2x8x8xf32> to vector<6x2x8x8xbf16>
    %c0_27 = arith.constant 0 : index
    %c0_28 = arith.constant 0 : index
    %c0_29 = arith.constant 0 : index
    %c0_30 = arith.constant 0 : index
    %66 = vector.load %arg9[%c0_27, %c0_28, %c0_29, %c0_30] : memref<6x2x8x8xbf16, #tpu.memory_space<vmem>>, vector<6x2x8x8xbf16>
    tpu.vector_store %arg9[%c0_27, %c0_28, %c0_29, %c0_30], %65 {strides = array<i32>} : memref<6x2x8x8xbf16, #tpu.memory_space<vmem>>, vector<6x2x8x8xbf16>,
    %67 = arith.truncf %63 : vector<12x8x8xf32> to vector<12x8x8xbf16>
    "tpu.trace_start"() <{level = 10 : i32, message = "blm,bmd->bld"}> : () -> ()
    %cst_31 = arith.constant dense<0.000000e+00> : vector<12x8x8xf32>
    %68 = tpu.matmul %67, %41, %cst_31 {dimension_numbers = #tpu.dot_dimension_numbers<[2], [1], [1], [2], [0, 0, 0, 1, 1, 2], [0], [0]>} : vector<12x8x8xbf16>, vector<12x8x8xbf16>, vector<12x8x8xf32> -> vector<12x8x8xf32>
    "tpu.trace_stop"() : () -> ()
    %69 = vector.shape_cast %68 : vector<12x8x8xf32> to vector<6x2x8x8xf32>
    %70 = vector.extract_strided_slice %69 {offsets = [0, 0, 0, 0], sizes = [6, 1, 8, 8], strides = [1, 1, 1, 1]} : vector<6x2x8x8xf32> to vector<6x1x8x8xf32>
    %71 = vector.shape_cast %70 : vector<6x1x8x8xf32> to vector<6x8x8xf32>
    %c0_32 = arith.constant 0 : index
    %c0_33 = arith.constant 0 : index
    %c0_34 = arith.constant 0 : index
    %72 = vector.load %arg8[%c0_32, %c0_33, %c0_34] : memref<6x8x16xf32, #tpu.memory_space<vmem>>, vector<6x8x8xf32>
    tpu.vector_store %arg8[%c0_32, %c0_33, %c0_34], %71 {strides = array<i32>} : memref<6x8x16xf32, #tpu.memory_space<vmem>>, vector<6x8x8xf32>,
    %73 = vector.extract_strided_slice %69 {offsets = [0, 1, 0, 0], sizes = [6, 1, 8, 8], strides = [1, 1, 1, 1]} : vector<6x2x8x8xf32> to vector<6x1x8x8xf32>
    %74 = vector.shape_cast %73 : vector<6x1x8x8xf32> to vector<6x8x8xf32>
    %c0_35 = arith.constant 0 : index
    %c0_36 = arith.constant 0 : index
    %c8 = arith.constant 8 : index
    %75 = vector.load %arg8[%c0_35, %c0_36, %c8] : memref<6x8x16xf32, #tpu.memory_space<vmem>>, vector<6x8x8xf32>
    tpu.vector_store %arg8[%c0_35, %c0_36, %c8], %74 {strides = array<i32>} : memref<6x8x16xf32, #tpu.memory_space<vmem>>, vector<6x8x8xf32>,
    return
  }
  func.func @transform_0(%arg0: i32) -> (i32, i32, i32) {
    %c0_i32 = arith.constant 0 : i32
    %c0_i32_0 = arith.constant 0 : i32
    %c0_i32_1 = arith.constant 0 : i32
    return %arg0, %c0_i32, %c0_i32_0 : i32, i32, i32
  }
  func.func @transform_1(%arg0: i32) -> (i32, i32, i32) {
    %c0_i32 = arith.constant 0 : i32
    %c0_i32_0 = arith.constant 0 : i32
    %c0_i32_1 = arith.constant 0 : i32
    return %arg0, %c0_i32, %c0_i32_0 : i32, i32, i32
  }
  func.func @transform_2(%arg0: i32) -> (i32, i32, i32) {
    %c0_i32 = arith.constant 0 : i32
    %c0_i32_0 = arith.constant 0 : i32
    %c0_i32_1 = arith.constant 0 : i32
    return %arg0, %c0_i32, %c0_i32_0 : i32, i32, i32
  }
  func.func @transform_3(%arg0: i32) -> (i32, i32, i32) {
    %c0_i32 = arith.constant 0 : i32
    %c0_i32_0 = arith.constant 0 : i32
    %c0_i32_1 = arith.constant 0 : i32
    return %arg0, %c0_i32, %c0_i32_0 : i32, i32, i32
  }
  func.func @transform_4(%arg0: i32) -> (i32, i32, i32) {
    %c0_i32 = arith.constant 0 : i32
    %c0_i32_0 = arith.constant 0 : i32
    %c0_i32_1 = arith.constant 0 : i32
    %c0_i32_2 = arith.constant 0 : i32
    return %c0_i32, %c0_i32_0, %c0_i32_1 : i32, i32, i32
  }
  func.func @transform_5(%arg0: i32) -> (i32, i32, i32) {
    %c0_i32 = arith.constant 0 : i32
    %c0_i32_0 = arith.constant 0 : i32
    %c0_i32_1 = arith.constant 0 : i32
    %c0_i32_2 = arith.constant 0 : i32
    return %c0_i32, %c0_i32_0, %c0_i32_1 : i32, i32, i32
  }
  func.func @transform_6(%arg0: i32) -> (i32, i32, i32) {
    %c0_i32 = arith.constant 0 : i32
    %c0_i32_0 = arith.constant 0 : i32
    %c0_i32_1 = arith.constant 0 : i32
    %c0_i32_2 = arith.constant 0 : i32
    return %c0_i32, %c0_i32_0, %c0_i32_1 : i32, i32, i32
  }
  func.func @transform_7(%arg0: i32) -> (i32, i32, i32) {
    %c0_i32 = arith.constant 0 : i32
    %c0_i32_0 = arith.constant 0 : i32
    %c0_i32_1 = arith.constant 0 : i32
    return %arg0, %c0_i32, %c0_i32_0 : i32, i32, i32
  }
  func.func @transform_8(%arg0: i32) -> (i32, i32, i32, i32) {
    %c0_i32 = arith.constant 0 : i32
    %c0_i32_0 = arith.constant 0 : i32
    %c0_i32_1 = arith.constant 0 : i32
    %c0_i32_2 = arith.constant 0 : i32
    return %arg0, %c0_i32, %c0_i32_0, %c0_i32_1 : i32, i32, i32, i32
  }
}

</mosaic_0001>

<bundles_post_ra>
// kernel: tpu_custom_call.1
= control target key start
LH: loop header
LB: loop body
LE: loop exit
PB: predicated region body
PF: predicated region fallthrough
CT: control target
= control target key end

     0   :  { %14 = vsyncpa [#allocation3], 0  ;;  %s4390_s0 = inlined_call_operand.vmem [shape: f32[6,8,16], index: 0, kind: input, shape index: {}]   ;;  %s4391_s1 = inlined_call_operand.vmem [shape: f32[6,8,16], index: 1, kind: input, shape index: {}]   ;;  %s4392_s2 = inlined_call_operand.vmem [shape: f32[6,8,16], index: 2, kind: input, shape index: {}]   ;;  %s4393_s3 = inlined_call_operand.hbm [shape: s8[6,8,8], index: 3, kind: input, shape index: {}]   ;;  %s4394_s4 = inlined_call_operand.vmem [shape: f32[2,16,8], index: 4, kind: input, shape index: {}]   ;;  %s4395_s5 = inlined_call_operand.vmem [shape: f32[2,16,8], index: 5, kind: input, shape index: {}]   ;;  %s4396_s6 = inlined_call_operand.vmem [shape: f32[2,16,8], index: 6, kind: input, shape index: {}]   ;;  %s4397_s7 = inlined_call_operand.hbm [shape: f32[6,8,16], index: 7, kind: output, shape index: {0}]   ;;  %s4398_s8 = inlined_call_operand.hbm [shape: bf16[6,2,8,8], index: 8, kind: output, shape index: {1}]  }
   0x1   :  { %15 = vsyncpa [#allocation4], 0 }
   0x2   :  { %16 = vsyncpa [#allocation7], 0  ;;  %s3697_s27 = smov [#allocation2]  }
   0x3   :  { %s28_s28 = sshll.u32 %s3697_s27, 4  ;;  %s29_s28 = int_to_ptr.vmem [resolvable:$true] %s28_s28 }
   0x4   :  { %s3639_s29 = scalar_lea.vmem %s29_s28, 192  ;;  %p3644_p1 = scmp.lt.s32.totalorder %s29_s28, %s29_s28 }
   0x5   :  { %p3640_p0 = scmp.ne.s32.totalorder %s29_s28, %s3639_s29  ;;  %p3645_p2 = scmp.lt.s32.totalorder %s3639_s29, %s3639_s29 }
   0x7   :  { %p3646_p3 = por %p3645_p2, %p3644_p1 }
   0x9   :  { %p3647_p4 = pnand %p3646_p3, %p3640_p0 }
   0xb   :  { %3650 = shalt.err (!%p3647_p4)
}
   0xc   :  { %s3698_s30 = smov 32   ;;  %s3699_s9 = smov 2  }
   0xd   :  { %34 = dma.hbm_to_vmem [thread:$0]  %s4393_s3, 192, %s29_s28, [#allocation3], %s3698_s30, %s3698_s30, %s3699_s9  }
   0xe   :  { %3691 = dma.done.wait [#allocation3], 192  }
   0xf   :  { %3692 = vsyncadd [#allocation3], 4294967104  ;;  %v3700_v0 = vmov 0.0   ;;  %vm3701_vm0 = vmmov 0   ;;  %v85_v1 = vld [vmem:[%s4394_s4 + $0x10] sm:$0xff]  ;;  %v86_v2 = vld [vmem:[%s4394_s4 + $0x18] sm:$0xff] }
  0x10   :  { %3217 = vmatprep.subr.bf16.mxu1 %v3700_v0  ;;  %3219 = vmatprep.mubr.msk.bf16.mxu1 %vm3701_vm0, %v3700_v0  ;;  %v47_v3 = vld [vmem:[%s4390_s0] sm:$0xff]  ;;  %v88_v4 = vpack.c.bf16 %v86_v2, %v85_v1  ;;  %v84_v6 = vld [vmem:[%s4394_s4 + $0x8] sm:$0xff]  ;;  %vm101_vm1 = vcmask 130048   ;;  %v49_v11 = vld [vmem:[%s4390_s0 + $0x10] sm:$0xff]  ;;  %vm1632_vm2 = vcmask 64512   ;;  %vm2411_vm3 = vcmask 1043456  }
  0x11   :  { %3211 = vmatprep.subr.bf16.mxu0 %v3700_v0  ;;  %3213 = vmatprep.mubr.msk.bf16.mxu0 %vm3701_vm0, %v3700_v0  ;;  %v83_v5 = vld [vmem:[%s4394_s4] sm:$0xff]  ;;  %v53_v7 = vpack.c.bf16 %v47_v3, %v47_v3  ;;  %v48_v9 = vld [vmem:[%s4390_s0 + $0x8] sm:$0xff]  ;;  %v55_v12 = vpack.c.bf16 %v49_v11, %v49_v11  ;;  %v50_v13 = vld [vmem:[%s4390_s0 + $0x18] sm:$0xff]  ;;  %s3704_s17 = smov [#allocation6]  }
  0x12   :  { %v87_v8 = vpack.c.bf16 %v84_v6, %v83_v5  ;;  %3218 = vmatpush3.bf16.msra.mxu1 %v88_v4  ;;  %v54_v10 = vpack.c.bf16 %v48_v9, %v48_v9  ;;  %v56_v14 = vpack.c.bf16 %v50_v13, %v50_v13  ;;  %v51_v15 = vld [vmem:[%s4390_s0 + $0x20] sm:$0xff]  ;;  %v52_v17 = vld [vmem:[%s4390_s0 + $0x28] sm:$0xff]  ;;  %v91_v18 = vld [vmem:[%s4395_s5 + $0x10] sm:$0xff]  ;;  %s3015_s18 = sshll.u32 %s3704_s17, 4  ;;  %s3016_s18 = int_to_ptr.vmem [resolvable:$true] %s3015_s18 }
  0x13   :  { %3229 = vmatprep.subr.bf16.mxu1 %v3700_v0  ;;  %v57_v16 = vpack.c.bf16 %v51_v15, %v51_v15  ;;  %v92_v19 = vld [vmem:[%s4395_s5 + $0x18] sm:$0xff]  ;;  %v58_v20 = vpack.c.bf16 %v52_v17, %v52_v17  ;;  %v89_v21 = vld [vmem:[%s4395_s5] sm:$0xff]  ;;  %v90_v22 = vld [vmem:[%s4395_s5 + $0x8] sm:$0xff]  ;;  %s3651_s19 = scalar_lea.vmem %s3016_s18, 768  ;;  %p3656_p6 = scmp.lt.s32.totalorder %s3016_s18, %s3016_s18 }
  0x14   :  { %3212 = vmatpush3.bf16.msra.mxu0 %v87_v8  ;;  %v94_v23 = vpack.c.bf16 %v92_v19, %v91_v18  ;;  %v93_v24 = vpack.c.bf16 %v90_v22, %v89_v21  ;;  %v59_v25 = vld [vmem:[%s4391_s1] sm:$0xff]  ;;  %v60_v27 = vld [vmem:[%s4391_s1 + $0x8] sm:$0xff]  ;;  %v61_v29 = vld [vmem:[%s4391_s1 + $0x10] sm:$0xff]  ;;  %p3652_p5 = scmp.ne.s32.totalorder %s3016_s18, %s3651_s19  ;;  %p3657_p7 = scmp.lt.s32.totalorder %s3651_s19, %s3651_s19 }
  0x15   :  { %3223 = vmatprep.subr.bf16.mxu0 %v3700_v0  ;;  %3220 = vmatmul.mubr.msk.bf16.vlgmr.msra.gmra.mxu1 %vm101_vm1, %v53_v7  ;;  %v65_v26 = vpack.c.bf16 %v59_v25, %v59_v25  ;;  %v66_v28 = vpack.c.bf16 %v60_v27, %v60_v27  ;;  %v67_v30 = vpack.c.bf16 %v61_v29, %v61_v29  ;;  %v62_v31 = vld [vmem:[%s4391_s1 + $0x18] sm:$0xff]  ;;  %v63_v33 = vld [vmem:[%s4391_s1 + $0x20] sm:$0xff]  ;;  %v64_v35 = vld [vmem:[%s4391_s1 + $0x28] sm:$0xff] }
  0x16   :  { %3230 = vmatpush3.bf16.msra.mxu1 %v88_v4  ;;  %3231 = vmatprep.mubr.msk.bf16.mxu1 %vm3701_vm0, %v3700_v0  ;;  %v68_v32 = vpack.c.bf16 %v62_v31, %v62_v31  ;;  %v69_v34 = vpack.c.bf16 %v63_v33, %v63_v33  ;;  %v97_v36 = vld [vmem:[%s4396_s6 + $0x10] sm:$0xff]  ;;  %v98_v37 = vld [vmem:[%s4396_s6 + $0x18] sm:$0xff]  ;;  %v70_v38 = vpack.c.bf16 %v64_v35, %v64_v35  ;;  %v95_v39 = vld [vmem:[%s4396_s6] sm:$0xff]  ;;  %p3658_p8 = por %p3657_p7, %p3656_p6 }
  0x17   :  { %3214 = vmatmul.mubr.msk.bf16.vlgmr.msra.gmra.mxu0 %vm101_vm1, %v53_v7  ;;  %3241 = vmatprep.subr.bf16.mxu1 %v3700_v0  ;;  %v96_v40 = vld [vmem:[%s4396_s6 + $0x8] sm:$0xff]  ;;  %v100_v41 = vpack.c.bf16 %v98_v37, %v97_v36  ;;  %v71_v43 = vld [vmem:[%s4392_s2] sm:$0xff]  ;;  %v73_v47 = vld [vmem:[%s4392_s2 + $0x10] sm:$0xff] }
  0x18   :  { %3224 = vmatpush3.bf16.msra.mxu0 %v87_v8  ;;  %3225 = vmatprep.mubr.msk.bf16.mxu0 %vm3701_vm0, %v3700_v0  ;;  %v99_v42 = vpack.c.bf16 %v96_v40, %v95_v39  ;;  %v77_v44 = vpack.c.bf16 %v71_v43, %v71_v43  ;;  %v72_v45 = vld [vmem:[%s4392_s2 + $0x8] sm:$0xff]  ;;  %v79_v48 = vpack.c.bf16 %v73_v47, %v73_v47  ;;  %v74_v49 = vld [vmem:[%s4392_s2 + $0x18] sm:$0xff]  ;;  %v75_v51 = vld [vmem:[%s4392_s2 + $0x20] sm:$0xff]  ;;  %p3659_p9 = pnand %p3658_p8, %p3652_p5 }
  0x19   :  { %3235 = vmatprep.subr.bf16.mxu0 %v3700_v0  ;;  %v78_v46 = vpack.c.bf16 %v72_v45, %v72_v45  ;;  %v80_v50 = vpack.c.bf16 %v74_v49, %v74_v49  ;;  %v81_v52 = vpack.c.bf16 %v75_v51, %v75_v51  ;;  %v76_v53 = vld [vmem:[%s4392_s2 + $0x28] sm:$0xff]  ;;  %s3703_s2 = smov 8  }
  0x1a   :  { %v82_v54 = vpack.c.bf16 %v76_v53, %v76_v53 }
  0x1d   :  { %3232 = vmatmul.mubr.msk.bf16.vlgmr.msra.gmra.mxu1 %vm101_vm1, %v54_v10 }
  0x1e   :  { %3242 = vmatpush3.bf16.msra.mxu1 %v88_v4  ;;  %3243 = vmatprep.mubr.msk.bf16.mxu1 %vm3701_vm0, %v3700_v0 }
  0x1f   :  { %3226 = vmatmul.mubr.msk.bf16.vlgmr.msra.gmra.mxu0 %vm101_vm1, %v54_v10  ;;  %3253 = vmatprep.subr.bf16.mxu1 %v3700_v0 }
  0x20   :  { %3236 = vmatpush3.bf16.msra.mxu0 %v87_v8  ;;  %3237 = vmatprep.mubr.msk.bf16.mxu0 %vm3701_vm0, %v3700_v0 }
  0x21   :  { %3247 = vmatprep.subr.bf16.mxu0 %v3700_v0 }
  0x25   :  { %3244 = vmatmul.mubr.msk.bf16.vlgmr.msra.gmra.mxu1 %vm101_vm1, %v55_v12 }
  0x26   :  { %3254 = vmatpush3.bf16.msra.mxu1 %v88_v4  ;;  %3255 = vmatprep.mubr.msk.bf16.mxu1 %vm3701_vm0, %v3700_v0 }
  0x27   :  { %3238 = vmatmul.mubr.msk.bf16.vlgmr.msra.gmra.mxu0 %vm101_vm1, %v55_v12  ;;  %3265 = vmatprep.subr.bf16.mxu1 %v3700_v0 }
  0x28   :  { %3248 = vmatpush3.bf16.msra.mxu0 %v87_v8  ;;  %3249 = vmatprep.mubr.msk.bf16.mxu0 %vm3701_vm0, %v3700_v0 }
  0x29   :  { %3259 = vmatprep.subr.bf16.mxu0 %v3700_v0 }
  0x2d   :  { %3256 = vmatmul.mubr.msk.bf16.vlgmr.msra.gmra.mxu1 %vm101_vm1, %v56_v14 }
  0x2e   :  { %3266 = vmatpush3.bf16.msra.mxu1 %v88_v4  ;;  %3267 = vmatprep.mubr.msk.bf16.mxu1 %vm3701_vm0, %v3700_v0 }
  0x2f   :  { %3250 = vmatmul.mubr.msk.bf16.vlgmr.msra.gmra.mxu0 %vm101_vm1, %v56_v14  ;;  %3277 = vmatprep.subr.bf16.mxu1 %v3700_v0 }
  0x30   :  { %3260 = vmatpush3.bf16.msra.mxu0 %v87_v8  ;;  %3261 = vmatprep.mubr.msk.bf16.mxu0 %vm3701_vm0, %v3700_v0 }
  0x31   :  { %3271 = vmatprep.subr.bf16.mxu0 %v3700_v0 }
  0x35   :  { %3268 = vmatmul.mubr.msk.bf16.vlgmr.msra.gmra.mxu1 %vm101_vm1, %v57_v16 }
  0x36   :  { %3278 = vmatpush3.bf16.msra.mxu1 %v88_v4  ;;  %3279 = vmatprep.mubr.msk.bf16.mxu1 %vm3701_vm0, %v3700_v0 }
  0x37   :  { %3262 = vmatmul.mubr.msk.bf16.vlgmr.msra.gmra.mxu0 %vm101_vm1, %v57_v16  ;;  %3289 = vmatprep.subr.bf16.mxu1 %v3700_v0 }
  0x38   :  { %3272 = vmatpush3.bf16.msra.mxu0 %v87_v8  ;;  %3273 = vmatprep.mubr.msk.bf16.mxu0 %vm3701_vm0, %v3700_v0 }
  0x39   :  { %3283 = vmatprep.subr.bf16.mxu0 %v3700_v0 }
  0x3d   :  { %3280 = vmatmul.mubr.msk.bf16.vlgmr.msra.gmra.mxu1 %vm101_vm1, %v58_v20 }
  0x3e   :  { %3290 = vmatpush3.bf16.msra.mxu1 %v94_v23  ;;  %3291 = vmatprep.mubr.msk.bf16.mxu1 %vm3701_vm0, %v3700_v0 }
  0x3f   :  { %3274 = vmatmul.mubr.msk.bf16.vlgmr.msra.gmra.mxu0 %vm101_vm1, %v58_v20  ;;  %3301 = vmatprep.subr.bf16.mxu1 %v3700_v0 }
  0x40   :  { %3284 = vmatpush3.bf16.msra.mxu0 %v93_v24  ;;  %3285 = vmatprep.mubr.msk.bf16.mxu0 %vm3701_vm0, %v3700_v0 }
  0x41   :  { %3295 = vmatprep.subr.bf16.mxu0 %v3700_v0 }
  0x45   :  { %3292 = vmatmul.mubr.msk.bf16.vlgmr.msra.gmra.mxu1 %vm101_vm1, %v65_v26 }
  0x46   :  { %3302 = vmatpush3.bf16.msra.mxu1 %v94_v23  ;;  %3303 = vmatprep.mubr.msk.bf16.mxu1 %vm3701_vm0, %v3700_v0 }
  0x47   :  { %3286 = vmatmul.mubr.msk.bf16.vlgmr.msra.gmra.mxu0 %vm101_vm1, %v65_v26  ;;  %3313 = vmatprep.subr.bf16.mxu1 %v3700_v0 }
  0x48   :  { %3296 = vmatpush3.bf16.msra.mxu0 %v93_v24  ;;  %3297 = vmatprep.mubr.msk.bf16.mxu0 %vm3701_vm0, %v3700_v0 }
  0x49   :  { %3307 = vmatprep.subr.bf16.mxu0 %v3700_v0 }
  0x4d   :  { %3304 = vmatmul.mubr.msk.bf16.vlgmr.msra.gmra.mxu1 %vm101_vm1, %v66_v28 }
  0x4e   :  { %3314 = vmatpush3.bf16.msra.mxu1 %v94_v23  ;;  %3315 = vmatprep.mubr.msk.bf16.mxu1 %vm3701_vm0, %v3700_v0 }
  0x4f   :  { %3298 = vmatmul.mubr.msk.bf16.vlgmr.msra.gmra.mxu0 %vm101_vm1, %v66_v28  ;;  %3325 = vmatprep.subr.bf16.mxu1 %v3700_v0 }
  0x50   :  { %3308 = vmatpush3.bf16.msra.mxu0 %v93_v24  ;;  %3309 = vmatprep.mubr.msk.bf16.mxu0 %vm3701_vm0, %v3700_v0 }
  0x51   :  { %3319 = vmatprep.subr.bf16.mxu0 %v3700_v0 }
  0x55   :  { %3316 = vmatmul.mubr.msk.bf16.vlgmr.msra.gmra.mxu1 %vm101_vm1, %v67_v30 }
  0x56   :  { %3326 = vmatpush3.bf16.msra.mxu1 %v94_v23  ;;  %3327 = vmatprep.mubr.msk.bf16.mxu1 %vm3701_vm0, %v3700_v0 }
  0x57   :  { %3310 = vmatmul.mubr.msk.bf16.vlgmr.msra.gmra.mxu0 %vm101_vm1, %v67_v30  ;;  %3337 = vmatprep.subr.bf16.mxu1 %v3700_v0 }
  0x58   :  { %3320 = vmatpush3.bf16.msra.mxu0 %v93_v24  ;;  %3321 = vmatprep.mubr.msk.bf16.mxu0 %vm3701_vm0, %v3700_v0 }
  0x59   :  { %3331 = vmatprep.subr.bf16.mxu0 %v3700_v0 }
  0x5d   :  { %3328 = vmatmul.mubr.msk.bf16.vlgmr.msra.gmra.mxu1 %vm101_vm1, %v68_v32 }
  0x5e   :  { %3338 = vmatpush3.bf16.msra.mxu1 %v94_v23  ;;  %3339 = vmatprep.mubr.msk.bf16.mxu1 %vm3701_vm0, %v3700_v0 }
  0x5f   :  { %3322 = vmatmul.mubr.msk.bf16.vlgmr.msra.gmra.mxu0 %vm101_vm1, %v68_v32  ;;  %3349 = vmatprep.subr.bf16.mxu1 %v3700_v0 }
  0x60   :  { %3332 = vmatpush3.bf16.msra.mxu0 %v93_v24  ;;  %3333 = vmatprep.mubr.msk.bf16.mxu0 %vm3701_vm0, %v3700_v0 }
  0x61   :  { %3343 = vmatprep.subr.bf16.mxu0 %v3700_v0 }
  0x65   :  { %3340 = vmatmul.mubr.msk.bf16.vlgmr.msra.gmra.mxu1 %vm101_vm1, %v69_v34 }
  0x66   :  { %3350 = vmatpush3.bf16.msra.mxu1 %v94_v23  ;;  %3351 = vmatprep.mubr.msk.bf16.mxu1 %vm3701_vm0, %v3700_v0 }
  0x67   :  { %3334 = vmatmul.mubr.msk.bf16.vlgmr.msra.gmra.mxu0 %vm101_vm1, %v69_v34  ;;  %3361 = vmatprep.subr.bf16.mxu1 %v3700_v0 }
  0x68   :  { %3344 = vmatpush3.bf16.msra.mxu0 %v93_v24  ;;  %3345 = vmatprep.mubr.msk.bf16.mxu0 %vm3701_vm0, %v3700_v0 }
  0x69   :  { %3355 = vmatprep.subr.bf16.mxu0 %v3700_v0 }
  0x6d   :  { %3352 = vmatmul.mubr.msk.bf16.vlgmr.msra.gmra.mxu1 %vm101_vm1, %v70_v38 }
  0x6e   :  { %3362 = vmatpush3.bf16.msra.mxu1 %v100_v41  ;;  %3363 = vmatprep.mubr.msk.bf16.mxu1 %vm3701_vm0, %v3700_v0 }
  0x6f   :  { %3346 = vmatmul.mubr.msk.bf16.vlgmr.msra.gmra.mxu0 %vm101_vm1, %v70_v38  ;;  %3373 = vmatprep.subr.bf16.mxu1 %v3700_v0 }
  0x70   :  { %3356 = vmatpush3.bf16.msra.mxu0 %v99_v42  ;;  %3357 = vmatprep.mubr.msk.bf16.mxu0 %vm3701_vm0, %v3700_v0 }
  0x71   :  { %3367 = vmatprep.subr.bf16.mxu0 %v3700_v0 }
  0x75   :  { %3364 = vmatmul.mubr.msk.bf16.vlgmr.msra.gmra.mxu1 %vm101_vm1, %v77_v44 }
  0x76   :  { %3374 = vmatpush3.bf16.msra.mxu1 %v100_v41  ;;  %3375 = vmatprep.mubr.msk.bf16.mxu1 %vm3701_vm0, %v3700_v0 }
  0x77   :  { %3385 = vmatprep.subr.bf16.mxu1 %v3700_v0  ;;  %3358 = vmatmul.mubr.msk.bf16.vlgmr.msra.gmra.mxu0 %vm101_vm1, %v77_v44 }
  0x78   :  { %3368 = vmatpush3.bf16.msra.mxu0 %v99_v42  ;;  %3369 = vmatprep.mubr.msk.bf16.mxu0 %vm3701_vm0, %v3700_v0 }
  0x79   :  { %3379 = vmatprep.subr.bf16.mxu0 %v3700_v0 }
  0x7d   :  { %3376 = vmatmul.mubr.msk.bf16.vlgmr.msra.gmra.mxu1 %vm101_vm1, %v78_v46 }
  0x7e   :  { %3386 = vmatpush3.bf16.msra.mxu1 %v100_v41  ;;  %3387 = vmatprep.mubr.msk.bf16.mxu1 %vm3701_vm0, %v3700_v0 }
  0x7f   :  { %3397 = vmatprep.subr.bf16.mxu1 %v3700_v0  ;;  %3370 = vmatmul.mubr.msk.bf16.vlgmr.msra.gmra.mxu0 %vm101_vm1, %v78_v46 }
  0x80   :  { %3380 = vmatpush3.bf16.msra.mxu0 %v99_v42  ;;  %3381 = vmatprep.mubr.msk.bf16.mxu0 %vm3701_vm0, %v3700_v0 }
  0x81   :  { %3391 = vmatprep.subr.bf16.mxu0 %v3700_v0 }
  0x85   :  { %3388 = vmatmul.mubr.msk.bf16.vlgmr.msra.gmra.mxu1 %vm101_vm1, %v79_v48 }
  0x86   :  { %3398 = vmatpush3.bf16.msra.mxu1 %v100_v41  ;;  %3399 = vmatprep.mubr.msk.bf16.mxu1 %vm3701_vm0, %v3700_v0 }
  0x87   :  { %3409 = vmatprep.subr.bf16.mxu1 %v3700_v0  ;;  %3382 = vmatmul.mubr.msk.bf16.vlgmr.msra.gmra.mxu0 %vm101_vm1, %v79_v48 }
  0x88   :  { %3392 = vmatpush3.bf16.msra.mxu0 %v99_v42  ;;  %3393 = vmatprep.mubr.msk.bf16.mxu0 %vm3701_vm0, %v3700_v0 }
  0x89   :  { %3403 = vmatprep.subr.bf16.mxu0 %v3700_v0 }
  0x8d   :  { %3400 = vmatmul.mubr.msk.bf16.vlgmr.msra.gmra.mxu1 %vm101_vm1, %v80_v50 }
  0x8e   :  { %3410 = vmatpush3.bf16.msra.mxu1 %v100_v41  ;;  %3411 = vmatprep.mubr.msk.bf16.mxu1 %vm3701_vm0, %v3700_v0 }
  0x8f   :  { %3421 = vmatprep.subr.bf16.mxu1 %v3700_v0  ;;  %3394 = vmatmul.mubr.msk.bf16.vlgmr.msra.gmra.mxu0 %vm101_vm1, %v80_v50 }
  0x90   :  { %3404 = vmatpush3.bf16.msra.mxu0 %v99_v42  ;;  %3405 = vmatprep.mubr.msk.bf16.mxu0 %vm3701_vm0, %v3700_v0 }
  0x91   :  { %3415 = vmatprep.subr.bf16.mxu0 %v3700_v0 }
  0x95   :  { %3412 = vmatmul.mubr.msk.bf16.vlgmr.msra.gmra.mxu1 %vm101_vm1, %v81_v52 }
  0x96   :  { %3422 = vmatpush3.bf16.msra.mxu1 %v100_v41  ;;  %3423 = vmatprep.mubr.msk.bf16.mxu1 %vm3701_vm0, %v3700_v0 }
  0x97   :  { %3406 = vmatmul.mubr.msk.bf16.vlgmr.msra.gmra.mxu0 %vm101_vm1, %v81_v52  ;;  %3433 = vmatprep.subr.bf16.mxu1 %v3700_v0 }
  0x98   :  { %3416 = vmatpush3.bf16.msra.mxu0 %v99_v42  ;;  %3417 = vmatprep.mubr.msk.bf16.mxu0 %vm3701_vm0, %v3700_v0 }
  0x99   :  { %3427 = vmatprep.subr.bf16.mxu0 %v3700_v0 }
  0x9d   :  { %3424 = vmatmul.mubr.msk.bf16.vlgmr.msra.gmra.mxu1 %vm101_vm1, %v82_v54 }
  0x9e   :  { %3435 = vmatprep.mubr.msk.bf16.mxu1 %vm3701_vm0, %v3700_v0 }
  0x9f   :  { %3418 = vmatmul.mubr.msk.bf16.vlgmr.msra.gmra.mxu0 %vm101_vm1, %v82_v54  ;;  %vm2395_vm1 = vcmask 60416  }
  0xa0   :  { %3429 = vmatprep.mubr.msk.bf16.mxu0 %vm3701_vm0, %v3700_v0 }
  0xd5   :  { %v3997_v55 = vpop.f32.mrf.mxu1 }
  0xd6   :  { %v601_v53 = vpack.c.bf16 %v3997_v55, %v3997_v55 }
  0xd7   :  { %v3221_v56 = vpop.f32.mrf.mxu1  ;;  %v3999_v57 = vpop.f32.mrf.mxu0 }
  0xd8   :  { %v600_v54 = vpack.c.bf16 %v3999_v57, %v3999_v57 }
  0xd9   :  { %v182_v58 = vpop.f32.mrf.mxu1  ;;  %v3215_v59 = vpop.f32.mrf.mxu0 }
  0xdb   :  { %v3222_v60 = vpop.f32.mrf.mxu1  ;;  %v142_v61 = vpop.f32.mrf.mxu0 }
  0xdd   :  { %v4001_v62 = vpop.f32.mrf.mxu1  ;;  %v3216_v63 = vpop.f32.mrf.mxu0 }
  0xdf   :  { %v3233_v1 = vpop.f32.mrf.mxu1  ;;  %v4003_v2 = vpop.f32.mrf.mxu0 }
  0xe1   :  { %v265_v3 = vpop.f32.mrf.mxu1  ;;  %v3227_v4 = vpop.f32.mrf.mxu0 }
  0xe3   :  { %v3234_v5 = vpop.f32.mrf.mxu1  ;;  %v225_v6 = vpop.f32.mrf.mxu0 }
  0xe4   :  { %v603_v6 = vpack.c.bf16 %v4001_v62, %v4001_v62 }
  0xe5   :  { %v4005_v7 = vpop.f32.mrf.mxu1  ;;  %v3228_v8 = vpop.f32.mrf.mxu0 }
  0xe6   :  { %v602_v8 = vpack.c.bf16 %v4003_v2, %v4003_v2 }
  0xe7   :  { %v3245_v9 = vpop.f32.mrf.mxu1  ;;  %v4007_v10 = vpop.f32.mrf.mxu0 }
  0xe9   :  { %v348_v11 = vpop.f32.mrf.mxu1  ;;  %v3239_v12 = vpop.f32.mrf.mxu0 }
  0xeb   :  { %v3246_v13 = vpop.f32.mrf.mxu1  ;;  %v308_v14 = vpop.f32.mrf.mxu0 }
  0xed   :  { %v4009_v15 = vpop.f32.mrf.mxu1  ;;  %v3240_v16 = vpop.f32.mrf.mxu0 }
  0xef   :  { %v3257_v17 = vpop.f32.mrf.mxu1  ;;  %v4011_v18 = vpop.f32.mrf.mxu0 }
  0xf1   :  { %v431_v19 = vpop.f32.mrf.mxu1  ;;  %v3251_v20 = vpop.f32.mrf.mxu0 }
  0xf3   :  { %v3258_v21 = vpop.f32.mrf.mxu1  ;;  %v391_v22 = vpop.f32.mrf.mxu0 }
  0xf4   :  { %v605_v22 = vpack.c.bf16 %v4005_v7, %v4005_v7 }
  0xf5   :  { %v4013_v23 = vpop.f32.mrf.mxu1  ;;  %v3252_v24 = vpop.f32.mrf.mxu0 }
  0xf6   :  { %v604_v24 = vpack.c.bf16 %v4007_v10, %v4007_v10 }
  0xf7   :  { %v3269_v25 = vpop.f32.mrf.mxu1  ;;  %v4015_v26 = vpop.f32.mrf.mxu0 }
  0xf9   :  { %v514_v27 = vpop.f32.mrf.mxu1  ;;  %v3263_v28 = vpop.f32.mrf.mxu0 }
  0xfb   :  { %v3270_v29 = vpop.f32.mrf.mxu1  ;;  %v474_v30 = vpop.f32.mrf.mxu0 }
  0xfd   :  { %v4017_v31 = vpop.f32.mrf.mxu1  ;;  %v3264_v32 = vpop.f32.mrf.mxu0 }
  0xff   :  { %v3281_v33 = vpop.f32.mrf.mxu1  ;;  %v4019_v34 = vpop.f32.mrf.mxu0 }
 0x101   :  { %v597_v35 = vpop.f32.mrf.mxu1  ;;  %v3275_v36 = vpop.f32.mrf.mxu0 }
 0x103   :  { %v3282_v37 = vpop.f32.mrf.mxu1  ;;  %v557_v38 = vpop.f32.mrf.mxu0 }
 0x104   :  { %v607_v38 = vpack.c.bf16 %v4009_v15, %v4009_v15 }
 0x105   :  { %v689_v39 = vpop.f32.mrf.mxu1  ;;  %v3276_v40 = vpop.f32.mrf.mxu0 }
 0x106   :  { %v1111_v41 = vpack.c.bf16 %v689_v39, %v689_v39  ;;  %v606_v39 = vpack.c.bf16 %v4011_v18, %v4011_v18 }
 0x107   :  { %v3293_v42 = vpop.f32.mrf.mxu1  ;;  %v649_v43 = vpop.f32.mrf.mxu0 }
 0x108   :  { %v1683_v44 = vsel %vm1632_vm2, %v1111_v41, 0  ;;  %v1110_v45 = vpack.c.bf16 %v649_v43, %v649_v43 }
 0x109   :  { %v692_v46 = vpop.f32.mrf.mxu1  ;;  %3434 = vmatpush3.bf16.xpose.msra.mxu1 %v1683_v44  ;;  %v3287_v47 = vpop.f32.mrf.mxu0 }
 0x10a   :  { %v1637_v48 = vsel %vm1632_vm2, %v1110_v45, 0  ;;  %3445 = vmatprep.subr.bf16.mxu1 %v3700_v0 }
 0x10b   :  { %v3294_v49 = vpop.f32.mrf.mxu1  ;;  %v652_v50 = vpop.f32.mrf.mxu0  ;;  %3428 = vmatpush3.bf16.xpose.msra.mxu0 %v1637_v48 }
 0x10c   :  { %3439 = vmatprep.subr.bf16.mxu0 %v3700_v0  ;;  %v609_v50 = vpack.c.bf16 %v4013_v23, %v4013_v23 }
 0x10d   :  { %v772_v51 = vpop.f32.mrf.mxu1  ;;  %v3288_v52 = vpop.f32.mrf.mxu0 }
 0x10e   :  { %v1113_v56 = vpack.c.bf16 %v772_v51, %v772_v51  ;;  %v608_v51 = vpack.c.bf16 %v4015_v26, %v4015_v26 }
 0x10f   :  { %v3305_v58 = vpop.f32.mrf.mxu1  ;;  %v732_v59 = vpop.f32.mrf.mxu0 }
 0x110   :  { %v1775_v60 = vsel %vm1632_vm2, %v1113_v56, 0  ;;  %3436 = vmatmul.mubr.msk.bf16.vlgmr.msra.gmra.mxu1 %vm1632_vm2, %v601_v53  ;;  %v1112_v61 = vpack.c.bf16 %v732_v59, %v732_v59 }
 0x111   :  { %v775_v63 = vpop.f32.mrf.mxu1  ;;  %3446 = vmatpush3.bf16.xpose.msra.mxu1 %v1775_v60  ;;  %v3299_v1 = vpop.f32.mrf.mxu0  ;;  %3447 = vmatprep.mubr.msk.bf16.mxu1 %vm3701_vm0, %v3700_v0 }
 0x112   :  { %v1729_v3 = vsel %vm1632_vm2, %v1112_v61, 0  ;;  %3430 = vmatmul.mubr.msk.bf16.vlgmr.msra.gmra.mxu0 %vm1632_vm2, %v600_v54  ;;  %3457 = vmatprep.subr.bf16.mxu1 %v3700_v0 }
 0x113   :  { %v3306_v55 = vpop.f32.mrf.mxu1  ;;  %v735_v57 = vpop.f32.mrf.mxu0  ;;  %3440 = vmatpush3.bf16.xpose.msra.mxu0 %v1729_v3  ;;  %3441 = vmatprep.mubr.msk.bf16.mxu0 %vm3701_vm0, %v3700_v0  ;;  %v611_v3 = vpack.c.bf16 %v4017_v31, %v4017_v31 }
 0x114   :  { %3451 = vmatprep.subr.bf16.mxu0 %v3700_v0  ;;  %v610_v55 = vpack.c.bf16 %v4019_v34, %v4019_v34 }
 0x115   :  { %v855_v4 = vpop.f32.mrf.mxu1  ;;  %v3300_v5 = vpop.f32.mrf.mxu0 }
 0x116   :  { %v1115_v9 = vpack.c.bf16 %v855_v4, %v855_v4 }
 0x117   :  { %v3317_v11 = vpop.f32.mrf.mxu1  ;;  %v815_v12 = vpop.f32.mrf.mxu0 }
 0x118   :  { %v1867_v13 = vsel %vm1632_vm2, %v1115_v9, 0  ;;  %3448 = vmatmul.mubr.msk.bf16.vlgmr.msra.gmra.mxu1 %vm1632_vm2, %v603_v6  ;;  %v1114_v14 = vpack.c.bf16 %v815_v12, %v815_v12 }
 0x119   :  { %v858_v16 = vpop.f32.mrf.mxu1  ;;  %3458 = vmatpush3.bf16.xpose.msra.mxu1 %v1867_v13  ;;  %v3311_v17 = vpop.f32.mrf.mxu0  ;;  %3459 = vmatprep.mubr.msk.bf16.mxu1 %vm3701_vm0, %v3700_v0 }
 0x11a   :  { %v1821_v19 = vsel %vm1632_vm2, %v1114_v14, 0  ;;  %3442 = vmatmul.mubr.msk.bf16.vlgmr.msra.gmra.mxu0 %vm1632_vm2, %v602_v8  ;;  %3469 = vmatprep.subr.bf16.mxu1 %v3700_v0 }
 0x11b   :  { %v3318_v62 = vpop.f32.mrf.mxu1  ;;  %v818_v2 = vpop.f32.mrf.mxu0  ;;  %3452 = vmatpush3.bf16.xpose.msra.mxu0 %v1821_v19  ;;  %3453 = vmatprep.mubr.msk.bf16.mxu0 %vm3701_vm0, %v3700_v0 }
 0x11c   :  { %3463 = vmatprep.subr.bf16.mxu0 %v3700_v0 }
 0x11d   :  { %v938_v20 = vpop.f32.mrf.mxu1  ;;  %v3312_v21 = vpop.f32.mrf.mxu0 }
 0x11e   :  { %v1117_v25 = vpack.c.bf16 %v938_v20, %v938_v20 }
 0x11f   :  { %v3329_v27 = vpop.f32.mrf.mxu1  ;;  %v898_v28 = vpop.f32.mrf.mxu0 }
 0x120   :  { %v1959_v29 = vsel %vm1632_vm2, %v1117_v25, 0  ;;  %3460 = vmatmul.mubr.msk.bf16.vlgmr.msra.gmra.mxu1 %vm1632_vm2, %v605_v22  ;;  %v1116_v30 = vpack.c.bf16 %v898_v28, %v898_v28 }
 0x121   :  { %v941_v32 = vpop.f32.mrf.mxu1  ;;  %3470 = vmatpush3.bf16.xpose.msra.mxu1 %v1959_v29  ;;  %v3323_v33 = vpop.f32.mrf.mxu0  ;;  %3471 = vmatprep.mubr.msk.bf16.mxu1 %vm3701_vm0, %v3700_v0 }
 0x122   :  { %v1913_v35 = vsel %vm1632_vm2, %v1116_v30, 0  ;;  %3454 = vmatmul.mubr.msk.bf16.vlgmr.msra.gmra.mxu0 %vm1632_vm2, %v604_v24  ;;  %3481 = vmatprep.subr.bf16.mxu1 %v3700_v0 }
 0x123   :  { %v3330_v7 = vpop.f32.mrf.mxu1  ;;  %v901_v10 = vpop.f32.mrf.mxu0  ;;  %3464 = vmatpush3.bf16.xpose.msra.mxu0 %v1913_v35  ;;  %3465 = vmatprep.mubr.msk.bf16.mxu0 %vm3701_vm0, %v3700_v0 }
 0x124   :  { %3475 = vmatprep.subr.bf16.mxu0 %v3700_v0 }
 0x125   :  { %v1021_v36 = vpop.f32.mrf.mxu1  ;;  %v3324_v37 = vpop.f32.mrf.mxu0 }
 0x126   :  { %v1119_v40 = vpack.c.bf16 %v1021_v36, %v1021_v36 }
 0x127   :  { %v3341_v41 = vpop.f32.mrf.mxu1  ;;  %v981_v42 = vpop.f32.mrf.mxu0 }
 0x128   :  { %v2051_v43 = vsel %vm1632_vm2, %v1119_v40, 0  ;;  %3472 = vmatmul.mubr.msk.bf16.vlgmr.msra.gmra.mxu1 %vm1632_vm2, %v607_v38  ;;  %v1118_v44 = vpack.c.bf16 %v981_v42, %v981_v42 }
 0x129   :  { %v1024_v45 = vpop.f32.mrf.mxu1  ;;  %3482 = vmatpush3.bf16.xpose.msra.mxu1 %v2051_v43  ;;  %v3335_v46 = vpop.f32.mrf.mxu0  ;;  %3483 = vmatprep.mubr.msk.bf16.mxu1 %vm3701_vm0, %v3700_v0 }
 0x12a   :  { %v2005_v47 = vsel %vm1632_vm2, %v1118_v44, 0  ;;  %3466 = vmatmul.mubr.msk.bf16.vlgmr.msra.gmra.mxu0 %vm1632_vm2, %v606_v39  ;;  %3493 = vmatprep.subr.bf16.mxu1 %v3700_v0 }
 0x12b   :  { %v3342_v15 = vpop.f32.mrf.mxu1  ;;  %v984_v18 = vpop.f32.mrf.mxu0  ;;  %3476 = vmatpush3.bf16.xpose.msra.mxu0 %v2005_v47  ;;  %3477 = vmatprep.mubr.msk.bf16.mxu0 %vm3701_vm0, %v3700_v0 }
 0x12c   :  { %3487 = vmatprep.subr.bf16.mxu0 %v3700_v0 }
 0x12d   :  { %v1104_v48 = vpop.f32.mrf.mxu1  ;;  %v3336_v49 = vpop.f32.mrf.mxu0 }
 0x12e   :  { %v1121_v52 = vpack.c.bf16 %v1104_v48, %v1104_v48 }
 0x12f   :  { %v3353_v53 = vpop.f32.mrf.mxu1  ;;  %v1064_v54 = vpop.f32.mrf.mxu0 }
 0x130   :  { %v2143_v56 = vsel %vm1632_vm2, %v1121_v52, 0  ;;  %3484 = vmatmul.mubr.msk.bf16.vlgmr.msra.gmra.mxu1 %vm1632_vm2, %v609_v50  ;;  %v1120_v58 = vpack.c.bf16 %v1064_v54, %v1064_v54 }
 0x131   :  { %v1107_v59 = vpop.f32.mrf.mxu1  ;;  %3494 = vmatpush3.bf16.xpose.msra.mxu1 %v2143_v56  ;;  %3495 = vmatprep.mubr.msk.bf16.mxu1 %vm3701_vm0, %v3700_v0  ;;  %v3347_v60 = vpop.f32.mrf.mxu0 }
 0x132   :  { %v2097_v61 = vsel %vm1632_vm2, %v1120_v58, 0  ;;  %3478 = vmatmul.mubr.msk.bf16.vlgmr.msra.gmra.mxu0 %vm1632_vm2, %v608_v51  ;;  %3505 = vmatprep.subr.bf16.mxu1 %v3700_v0 }
 0x133   :  { %v3354_v23 = vpop.f32.mrf.mxu1  ;;  %3488 = vmatpush3.bf16.xpose.msra.mxu0 %v2097_v61  ;;  %3489 = vmatprep.mubr.msk.bf16.mxu0 %vm3701_vm0, %v3700_v0  ;;  %v1067_v26 = vpop.f32.mrf.mxu0 }
 0x134   :  { %3499 = vmatprep.subr.bf16.mxu0 %v3700_v0 }
 0x135   :  { %v1199_v63 = vpop.f32.mrf.mxu1  ;;  %v3348_v1 = vpop.f32.mrf.mxu0 }
 0x136   :  { %v1621_v57 = vpack.c.bf16 %v1199_v63, %v1199_v63 }
 0x137   :  { %v3365_v4 = vpop.f32.mrf.mxu1  ;;  %v1159_v5 = vpop.f32.mrf.mxu0 }
 0x138   :  { %3496 = vmatmul.mubr.msk.bf16.vlgmr.msra.gmra.mxu1 %vm1632_vm2, %v611_v3  ;;  %v2459_v6 = vsel %vm2411_vm3, %v1621_v57, 0  ;;  %v1620_v8 = vpack.c.bf16 %v1159_v5, %v1159_v5 }
 0x139   :  { %v1202_v9 = vpop.f32.mrf.mxu1  ;;  %3506 = vmatpush3.bf16.msra.mxu1 %v2459_v6  ;;  %v3359_v11 = vpop.f32.mrf.mxu0  ;;  %3507 = vmatprep.mubr.msk.bf16.mxu1 %vm3701_vm0, %v3700_v0 }
 0x13a   :  { %3490 = vmatmul.mubr.msk.bf16.vlgmr.msra.gmra.mxu0 %vm1632_vm2, %v610_v55  ;;  %v2413_v31 = vsel %vm2411_vm3, %v1620_v8, 0  ;;  %3517 = vmatprep.subr.bf16.mxu1 %v3700_v0 }
 0x13b   :  { %v3366_v34 = vpop.f32.mrf.mxu1  ;;  %v1162_v12 = vpop.f32.mrf.mxu0  ;;  %3500 = vmatpush3.bf16.msra.mxu0 %v2413_v31  ;;  %3501 = vmatprep.mubr.msk.bf16.mxu0 %vm3701_vm0, %v3700_v0 }
 0x13c   :  { %3511 = vmatprep.subr.bf16.mxu0 %v3700_v0  ;;  %v2197_v34 = vld [vmem:[#allocation2] sm:$0x3]  ;;  %v3702_v12 = vmov 0  }
 0x13d   :  { %v1282_v13 = vpop.f32.mrf.mxu1  ;;  %v3360_v14 = vpop.f32.mrf.mxu0  ;;  %vm2203_vm4 = vnez %v2197_v34 }
 0x13e   :  { %v1623_v16 = vpack.c.bf16 %v1282_v13, %v1282_v13  ;;  %v2209_v13 = vsel %vm2203_vm4, 16843009, %v3702_v12  ;;  %v2198_v14 = vld [vmem:[#allocation2 + $0x2] sm:$0x3] }
 0x13f   :  { %v3377_v17 = vpop.f32.mrf.mxu1  ;;  %v1242_v19 = vpop.f32.mrf.mxu0  ;;  %vm2204_vm5 = vnez %v2198_v14 }
 0x140   :  { %v4110_v62 = vsel %vm2411_vm3, %v1623_v16, 0  ;;  %v1622_v2 = vpack.c.bf16 %v1242_v19, %v1242_v19  ;;  %v2215_v16 = vunpack.c.0.s8 %v2209_v13 }
 0x141   :  { %v1285_v20 = vpop.f32.mrf.mxu1  ;;  %v3371_v21 = vpop.f32.mrf.mxu0 }
 0x142   :  { %v4113_v22 = vsel %vm2411_vm3, %v1622_v2, 0  ;;  %vm4140_vm6 = vcmp.ne.s32.totalorder %v2215_v16, 0  ;;  %v2210_v20 = vsel %vm2204_vm5, 16843009, %v3702_v12 }
 0x143   :  { %v3378_v24 = vpop.f32.mrf.mxu1  ;;  %v1245_v25 = vpop.f32.mrf.mxu0 }
 0x145   :  { %v1365_v27 = vpop.f32.mrf.mxu1  ;;  %v3372_v28 = vpop.f32.mrf.mxu0 }
 0x146   :  { %v1625_v29 = vpack.c.bf16 %v1365_v27, %v1365_v27  ;;  %v2199_v27 = vld [vmem:[#allocation2 + $0x4] sm:$0x3] }
 0x147   :  { %v3389_v30 = vpop.f32.mrf.mxu1  ;;  %v1325_v32 = vpop.f32.mrf.mxu0  ;;  %vm2205_vm7 = vnez %v2199_v27 }
 0x148   :  { %v4116_v33 = vsel %vm2411_vm3, %v1625_v29, 0  ;;  %v1624_v35 = vpack.c.bf16 %v1325_v32, %v1325_v32  ;;  %v2216_v32 = vunpack.c.0.s8 %v2210_v20 }
 0x149   :  { %v1368_v7 = vpop.f32.mrf.mxu1  ;;  %v3383_v10 = vpop.f32.mrf.mxu0 }
 0x14a   :  { %v4119_v36 = vsel %vm2411_vm3, %v1624_v35, 0  ;;  %vm4151_vm8 = vcmp.ne.s32.totalorder %v2216_v32, 0 }
 0x14b   :  { %v3390_v37 = vpop.f32.mrf.mxu1  ;;  %v1328_v38 = vpop.f32.mrf.mxu0 }
 0x14d   :  { %v1448_v39 = vpop.f32.mrf.mxu1  ;;  %v3384_v40 = vpop.f32.mrf.mxu0 }
 0x14e   :  { %v1627_v41 = vpack.c.bf16 %v1448_v39, %v1448_v39  ;;  %v2211_v40 = vsel %vm2205_vm7, 16843009, %v3702_v12 }
 0x14f   :  { %v3401_v42 = vpop.f32.mrf.mxu1  ;;  %v1408_v43 = vpop.f32.mrf.mxu0 }
 0x150   :  { %v4122_v44 = vsel %vm2411_vm3, %v1627_v41, 0  ;;  %v1626_v45 = vpack.c.bf16 %v1408_v43, %v1408_v43 }
 0x151   :  { %v1451_v46 = vpop.f32.mrf.mxu1  ;;  %v3395_v47 = vpop.f32.mrf.mxu0 }
 0x152   :  { %v4125_v15 = vsel %vm2411_vm3, %v1626_v45, 0  ;;  %v2200_v45 = vld [vmem:[#allocation2 + $0x6] sm:$0x3] }
 0x153   :  { %v3402_v18 = vpop.f32.mrf.mxu1  ;;  %v1411_v48 = vpop.f32.mrf.mxu0  ;;  %vm2206_vm9 = vnez %v2200_v45 }
 0x154   :  { %v2217_v48 = vunpack.c.0.s8 %v2211_v40 }
 0x155   :  { %v1531_v49 = vpop.f32.mrf.mxu1  ;;  %v3396_v50 = vpop.f32.mrf.mxu0 }
 0x156   :  { %v1629_v51 = vpack.c.bf16 %v1531_v49, %v1531_v49  ;;  %vm4162_vm10 = vcmp.ne.s32.totalorder %v2217_v48, 0 }
 0x157   :  { %v3413_v52 = vpop.f32.mrf.mxu1  ;;  %v1491_v53 = vpop.f32.mrf.mxu0 }
 0x158   :  { %v4128_v54 = vsel %vm2411_vm3, %v1629_v51, 0  ;;  %v1628_v56 = vpack.c.bf16 %v1491_v53, %v1491_v53 }
 0x159   :  { %v1534_v58 = vpop.f32.mrf.mxu1  ;;  %v3407_v59 = vpop.f32.mrf.mxu0 }
 0x15a   :  { %v4131_v60 = vsel %vm2411_vm3, %v1628_v56, 0  ;;  %v2212_v58 = vsel %vm2206_vm9, 16843009, %v3702_v12 }
 0x15b   :  { %v3414_v61 = vpop.f32.mrf.mxu1  ;;  %v1494_v23 = vpop.f32.mrf.mxu0 }
 0x15d   :  { %v1614_v26 = vpop.f32.mrf.mxu1  ;;  %v3408_v63 = vpop.f32.mrf.mxu0 }
 0x15e   :  { %v1631_v1 = vpack.c.bf16 %v1614_v26, %v1614_v26  ;;  %v2201_v26 = vld [vmem:[#allocation2 + $0x8] sm:$0x3] }
 0x15f   :  { %v3425_v3 = vpop.f32.mrf.mxu1  ;;  %v1574_v55 = vpop.f32.mrf.mxu0  ;;  %vm2207_vm11 = vnez %v2201_v26 }
 0x160   :  { %v4134_v57 = vsel %vm2411_vm3, %v1631_v1, 0  ;;  %v1630_v4 = vpack.c.bf16 %v1574_v55, %v1574_v55  ;;  %v2218_v55 = vunpack.c.0.s8 %v2212_v58  ;;  %v2213_v34 = vsel %vm2207_vm11, 16843009, %v3702_v12 }
 0x161   :  { %v1617_v5 = vpop.f32.mrf.mxu1  ;;  %v3419_v6 = vpop.f32.mrf.mxu0  ;;  %v2219_v27 = vunpack.c.0.s8 %v2213_v34 }
 0x162   :  { %v4137_v8 = vsel %vm2411_vm3, %v1630_v4, 0  ;;  %vm4173_vm12 = vcmp.ne.s32.totalorder %v2218_v55, 0 }
 0x163   :  { %v3426_v9 = vpop.f32.mrf.mxu1  ;;  %v1577_v11 = vpop.f32.mrf.mxu0  ;;  %vm4184_vm14 = vcmp.ne.s32.totalorder %v2219_v27, 0 }
 0x165   :  { %v3420_v31 = vpop.f32.mrf.mxu0 }
 0x1d0   :  { %v1719_v17 = vpop.f32.mrf.mxu1 }
 0x1d1   :  { %v2186_v2 = vmul.f32 0.35355338, %v1719_v17  ;;  %v2202_v17 = vld [vmem:[#allocation2 + $0xa] sm:$0x3] }
 0x1d2   :  { %v3437_v21 = vpop.f32.mrf.mxu1  ;;  %v1673_v24 = vpop.f32.mrf.mxu0  ;;  %vm2208_vm13 = vnez %v2202_v17 }
 0x1d3   :  { %v4147_v25 = vsel %vm4140_vm6, -1e+09, %v2186_v2 }
 0x1d4   :  { %v1722_v28 = vpop.f32.mrf.mxu1  ;;  %v2254_v29 = vsel %vm1632_vm2, %v4147_v25, -inf  ;;  %v3431_v30 = vpop.f32.mrf.mxu0 }
 0x1d5   :  { %2255 = vmax.xlane.f32.xlu0 %v2254_v29  ;;  %v2185_v30 = vmul.f32 0.35355338, %v1673_v24 }
 0x1d6   :  { %v3438_v35 = vpop.f32.mrf.mxu1  ;;  %v1676_v7 = vpop.f32.mrf.mxu0 }
 0x1d8   :  { %v1811_v10 = vpop.f32.mrf.mxu1  ;;  %v3432_v38 = vpop.f32.mrf.mxu0 }
 0x1d9   :  { %v2188_v39 = vmul.f32 0.35355338, %v1811_v10  ;;  %v2214_v38 = vsel %vm2208_vm13, 16843009, %v3702_v12 }
 0x1da   :  { %v3449_v41 = vpop.f32.mrf.mxu1  ;;  %v1765_v42 = vpop.f32.mrf.mxu0  ;;  %v2220_v48 = vunpack.c.0.s8 %v2214_v38 }
 0x1db   :  { %v4158_v43 = vsel %vm4151_vm8, -1e+09, %v2188_v39 }
 0x1dc   :  { %v1814_v46 = vpop.f32.mrf.mxu1  ;;  %v2260_v47 = vsel %vm1632_vm2, %v4158_v43, -inf  ;;  %v3443_v18 = vpop.f32.mrf.mxu0  ;;  %vm4205_vm15 = vcmp.ne.s32.totalorder %v2220_v48, 0 }
 0x1dd   :  { %2261 = vmax.xlane.f32.xlu0 %v2260_v47  ;;  %v4195_v46 = vsel %vm4140_vm6, -1e+09, %v2185_v30 }
 0x1de   :  { %v3450_v49 = vpop.f32.mrf.mxu1  ;;  %v1768_v50 = vpop.f32.mrf.mxu0 }
 0x1df   :  { %v2187_v49 = vmul.f32 0.35355338, %v1765_v42  ;;  %v2251_v50 = vsel %vm1632_vm2, %v4195_v46, -inf }
 0x1e0   :  { %v1903_v51 = vpop.f32.mrf.mxu1  ;;  %v3444_v53 = vpop.f32.mrf.mxu0 }
 0x1e1   :  { %v2190_v56 = vmul.f32 0.35355338, %v1903_v51 }
 0x1e2   :  { %v3461_v59 = vpop.f32.mrf.mxu1  ;;  %v1857_v61 = vpop.f32.mrf.mxu0 }
 0x1e3   :  { %v4169_v23 = vsel %vm4162_vm10, -1e+09, %v2190_v56  ;;  %v2189_v41 = vmul.f32 0.35355338, %v1857_v61 }
 0x1e4   :  { %v1906_v63 = vpop.f32.mrf.mxu1  ;;  %v2266_v1 = vsel %vm1632_vm2, %v4169_v23, -inf  ;;  %v3455_v3 = vpop.f32.mrf.mxu0 }
 0x1e5   :  { %2267 = vmax.xlane.f32.xlu1 %v2266_v1  ;;  %v4203_v56 = vsel %vm4162_vm10, -1e+09, %v2189_v41  ;;  %v4213_v3 = vsel %vm4151_vm8, -1e+09, %v2187_v49 }
 0x1e6   :  { %v3462_v4 = vpop.f32.mrf.mxu1  ;;  %v1860_v5 = vpop.f32.mrf.mxu0  ;;  %v2263_v63 = vsel %vm1632_vm2, %v4203_v56, -inf  ;;  %v2257_v37 = vsel %vm1632_vm2, %v4213_v3, -inf }
 0x1e8   :  { %v1995_v6 = vpop.f32.mrf.mxu1  ;;  %v3456_v11 = vpop.f32.mrf.mxu0 }
 0x1e9   :  { %v2192_v31 = vmul.f32 0.35355338, %v1995_v6 }
 0x1ea   :  { %v3473_v13 = vpop.f32.mrf.mxu1  ;;  %v1949_v14 = vpop.f32.mrf.mxu0 }
 0x1eb   :  { %v4180_v16 = vsel %vm4173_vm12, -1e+09, %v2192_v31  ;;  %v2191_v26 = vmul.f32 0.35355338, %v1949_v14 }
 0x1ec   :  { %v1998_v2 = vpop.f32.mrf.mxu1  ;;  %v2272_v20 = vsel %vm1632_vm2, %v4180_v16, -inf  ;;  %v3467_v21 = vpop.f32.mrf.mxu0 }
 0x1ed   :  { %2273 = vmax.xlane.f32.xlu1 %v2272_v20  ;;  %v4228_v14 = vsel %vm4173_vm12, -1e+09, %v2191_v26 }
 0x1ee   :  { %v3474_v28 = vpop.f32.mrf.mxu1  ;;  %v1952_v29 = vpop.f32.mrf.mxu0  ;;  %v2269_v20 = vsel %vm1632_vm2, %v4228_v14, -inf }
 0x1f0   :  { %v2087_v32 = vpop.f32.mrf.mxu1  ;;  %v3468_v7 = vpop.f32.mrf.mxu0 }
 0x1f1   :  { %v2194_v10 = vmul.f32 0.35355338, %v2087_v32 }
 0x1f2   :  { %v3485_v39 = vpop.f32.mrf.mxu1  ;;  %v2041_v40 = vpop.f32.mrf.mxu0 }
 0x1f3   :  { %v4191_v45 = vsel %vm4184_vm14, -1e+09, %v2194_v10  ;;  %v2193_v53 = vmul.f32 0.35355338, %v2041_v40 }
 0x1f4   :  { %v2090_v24 = vpop.f32.mrf.mxu1  ;;  %v2278_v47 = vsel %vm1632_vm2, %v4191_v45, -inf  ;;  %v3479_v18 = vpop.f32.mrf.mxu0 }
 0x1f5   :  { %2279 = vmax.xlane.f32.xlu0 %v2278_v47  ;;  %v4219_v4 = vsel %vm4184_vm14, -1e+09, %v2193_v53 }
 0x1f6   :  { %v3486_v12 = vpop.f32.mrf.mxu1  ;;  %v2044_v51 = vpop.f32.mrf.mxu0  ;;  %v2275_v34 = vsel %vm1632_vm2, %v4219_v4, -inf }
 0x1f8   :  { %v2179_v19 = vpop.f32.mrf.mxu1  ;;  %v3480_v59 = vpop.f32.mrf.mxu0 }
 0x1f9   :  { %v2196_v61 = vmul.f32 0.35355338, %v2179_v19  ;;  %2252 = vmax.xlane.f32.xlu0 %v2251_v50 }
 0x1fa   :  { %v3497_v42 = vpop.f32.mrf.mxu1  ;;  %v2133_v1 = vpop.f32.mrf.mxu0 }
 0x1fb   :  { %v2250_v52 = vsel %vm4205_vm15, -1e+09, %v2196_v61  ;;  %v2195_v55 = vmul.f32 0.35355338, %v2133_v1 }
 0x1fc   :  { %v2182_v5 = vpop.f32.mrf.mxu1  ;;  %v2284_v6 = vsel %vm1632_vm2, %v2250_v52, -inf  ;;  %v3491_v11 = vpop.f32.mrf.mxu0 }
 0x1fd   :  { %2285 = vmax.xlane.f32.xlu1 %v2284_v6  ;;  %2264 = vmax.xlane.f32.xlu0 %v2263_v63  ;;  %v4232_v17 = vsel %vm4205_vm15, -1e+09, %v2195_v55 }
 0x1fe   :  { %v3498_v31 = vpop.f32.mrf.mxu1  ;;  %v2136_v13 = vpop.f32.mrf.mxu0  ;;  %v2281_v21 = vsel %vm1632_vm2, %v4232_v17, -inf }
 0x200   :  { %v3492_v2 = vpop.f32.mrf.mxu0 }
 0x201   :  { %2258 = vmax.xlane.f32.xlu1 %v2257_v37  ;;  %2276 = vmax.xlane.f32.xlu0 %v2275_v34 }
 0x205   :  { %2270 = vmax.xlane.f32.xlu1 %v2269_v20  ;;  %2282 = vmax.xlane.f32.xlu0 %v2281_v21 }
 0x25e   :  { %v2256_v27 = vpop.xlane.xlu0 %2255 }
 0x25f   :  { %v2288_v9 = vsub.f32 %v4147_v25, %v2256_v27 }
 0x261   :  { %v2301_v28 = vmul.f32 1.442695, %v2288_v9 }
 0x263   :  { %3583 = vpow2.f32 %v2301_v28 }
 0x266   :  { %v2262_v29 = vpop.xlane.xlu0 %2261 }
 0x267   :  { %v2290_v30 = vsub.f32 %v4158_v43, %v2262_v29 }
 0x269   :  { %v2305_v32 = vmul.f32 1.442695, %v2290_v30 }
 0x26b   :  { %3585 = vpow2.f32 %v2305_v32 }
 0x26e   :  { %v2268_v35 = vpop.xlane.xlu1 %2267 }
 0x26f   :  { %v2292_v7 = vsub.f32 %v4169_v23, %v2268_v35 }
 0x270   :  { %v4241_v10 = vpop.eup %3583 }
 0x271   :  { %v2309_v38 = vmul.f32 1.442695, %v2292_v7  ;;  %v2326_v39 = vsel %vm1632_vm2, %v4241_v10, 0.0 }
 0x272   :  { %2327 = vadd.xlane.f32.xlu1 %v2326_v39 }
 0x273   :  { %3587 = vpow2.f32 %v2309_v38 }
 0x276   :  { %v2274_v40 = vpop.xlane.xlu1 %2273 }
 0x277   :  { %v2294_v25 = vsub.f32 %v4180_v16, %v2274_v40 }
 0x278   :  { %v4246_v41 = vpop.eup %3585 }
 0x279   :  { %v2313_v24 = vmul.f32 1.442695, %v2294_v25  ;;  %v2332_v43 = vsel %vm1632_vm2, %v4246_v41, 0.0 }
 0x27a   :  { %2333 = vadd.xlane.f32.xlu1 %v2332_v43 }
 0x27b   :  { %3589 = vpow2.f32 %v2313_v24 }
 0x27e   :  { %v2280_v23 = vpop.xlane.xlu0 %2279 }
 0x27f   :  { %v2296_v47 = vsub.f32 %v4191_v45, %v2280_v23 }
 0x280   :  { %v4251_v18 = vpop.eup %3587 }
 0x281   :  { %v2317_v48 = vmul.f32 1.442695, %v2296_v47  ;;  %v2338_v49 = vsel %vm1632_vm2, %v4251_v18, 0.0 }
 0x282   :  { %v2253_v12 = vpop.xlane.xlu0 %2252  ;;  %2339 = vadd.xlane.f32.xlu0 %v2338_v49 }
 0x283   :  { %3591 = vpow2.f32 %v2317_v48  ;;  %v2287_v16 = vsub.f32 %v4195_v46, %v2253_v12 }
 0x285   :  { %v2299_v50 = vmul.f32 1.442695, %v2287_v16 }
 0x286   :  { %v2286_v51 = vpop.xlane.xlu1 %2285  ;;  %v2265_v53 = vpop.xlane.xlu0 %2264 }
 0x287   :  { %3593 = vpow2.f32 %v2299_v50  ;;  %v2298_v19 = vsub.f32 %v2250_v52, %v2286_v51  ;;  %v2291_v58 = vsub.f32 %v4203_v56, %v2265_v53 }
 0x288   :  { %v4257_v59 = vpop.eup %3589 }
 0x289   :  { %v2321_v45 = vmul.f32 1.442695, %v2298_v19  ;;  %v2307_v61 = vmul.f32 1.442695, %v2291_v58  ;;  %v2344_v26 = vsel %vm1632_vm2, %v4257_v59, 0.0 }
 0x28a   :  { %v2259_v42 = vpop.xlane.xlu1 %2258  ;;  %2345 = vadd.xlane.f32.xlu1 %v2344_v26  ;;  %v2277_v63 = vpop.xlane.xlu0 %2276 }
 0x28b   :  { %3595 = vpow2.f32 %v2321_v45  ;;  %v2289_v46 = vsub.f32 %v4213_v3, %v2259_v42  ;;  %v2295_v1 = vsub.f32 %v4219_v4, %v2277_v63 }
 0x28c   :  { %3597 = vpow2.f32 %v2307_v61 }
 0x28d   :  { %v2303_v55 = vmul.f32 1.442695, %v2289_v46  ;;  %v2315_v52 = vmul.f32 1.442695, %v2295_v1 }
 0x28e   :  { %v2271_v5 = vpop.xlane.xlu1 %2270  ;;  %v2283_v56 = vpop.xlane.xlu0 %2282 }
 0x28f   :  { %3599 = vpow2.f32 %v2303_v55  ;;  %v2293_v6 = vsub.f32 %v4228_v14, %v2271_v5  ;;  %v2297_v11 = vsub.f32 %v4232_v17, %v2283_v56 }
 0x290   :  { %v4265_v31 = vpop.eup %3591  ;;  %3601 = vpow2.f32 %v2315_v52 }
 0x291   :  { %v2311_v37 = vmul.f32 1.442695, %v2293_v6  ;;  %v2319_v34 = vmul.f32 1.442695, %v2297_v11  ;;  %v2350_v3 = vsel %vm1632_vm2, %v4265_v31, 0.0 }
 0x292   :  { %2351 = vadd.xlane.f32.xlu0 %v2350_v3 }
 0x293   :  { %3603 = vpow2.f32 %v2311_v37 }
 0x294   :  { %v4269_v4 = vpop.eup %3593  ;;  %3605 = vpow2.f32 %v2319_v34 }
 0x295   :  { %v2323_v13 = vsel %vm1632_vm2, %v4269_v4, 0.0 }
 0x296   :  { %2324 = vadd.xlane.f32.xlu0 %v2323_v13 }
 0x298   :  { %v4273_v14 = vpop.eup %3595 }
 0x299   :  { %v4275_v17 = vpop.eup %3597  ;;  %v2356_v2 = vsel %vm1632_vm2, %v4273_v14, 0.0 }
 0x29a   :  { %2357 = vadd.xlane.f32.xlu1 %v2356_v2  ;;  %v2335_v20 = vsel %vm1632_vm2, %v4275_v17, 0.0 }
 0x29b   :  { %2336 = vadd.xlane.f32.xlu0 %v2335_v20 }
 0x29c   :  { %v4281_v21 = vpop.eup %3599 }
 0x29d   :  { %v4283_v27 = vpop.eup %3601  ;;  %v2329_v9 = vsel %vm1632_vm2, %v4281_v21, 0.0 }
 0x29e   :  { %2330 = vadd.xlane.f32.xlu1 %v2329_v9  ;;  %v2347_v28 = vsel %vm1632_vm2, %v4283_v27, 0.0 }
 0x29f   :  { %2348 = vadd.xlane.f32.xlu0 %v2347_v28 }
 0x2a0   :  { %v4289_v29 = vpop.eup %3603 }
 0x2a1   :  { %v2341_v30 = vsel %vm1632_vm2, %v4289_v29, 0.0  ;;  %v4293_v32 = vpop.eup %3605 }
 0x2a2   :  { %2342 = vadd.xlane.f32.xlu1 %v2341_v30  ;;  %v2353_v35 = vsel %vm1632_vm2, %v4293_v32, 0.0 }
 0x2a6   :  { %2354 = vadd.xlane.f32.xlu1 %v2353_v35 }
 0x2fb   :  { %v2328_v7 = vpop.xlane.xlu1 %2327 }
 0x2fc   :  { %3607 = vrcp.f32 %v2328_v7 }
 0x303   :  { %v2334_v38 = vpop.xlane.xlu1 %2333 }
 0x304   :  { %3609 = vrcp.f32 %v2334_v38 }
 0x309   :  { %v3608_v39 = vpop.eup %3607 }
 0x30a   :  { %v2372_v40 = vmul.f32 %v3608_v39, %v4241_v10 }
 0x30b   :  { %v2340_v25 = vpop.xlane.xlu0 %2339 }
 0x30c   :  { %3611 = vrcp.f32 %v2340_v25  ;;  %v2384_v24 = vpack.c.bf16 %v2372_v40, %v2372_v40 }
 0x30e   :  { %2397 = vst.msk [vmem:[#allocation6 + $0x4] sm:$0xf] %vm2395_vm1, %v2384_v24  ;;  %3508 = vmatmul.mubr.msk.bf16.vlgmr.msra.gmra.mxu1 %vm1632_vm2, %v2384_v24 }
 0x30f   :  { %3518 = vmatpush3.bf16.msra.mxu1 %v4110_v62  ;;  %3519 = vmatprep.mubr.msk.bf16.mxu1 %vm3701_vm0, %v3700_v0 }
 0x310   :  { %3529 = vmatprep.subr.bf16.mxu1 %v3700_v0 }
 0x311   :  { %v3610_v43 = vpop.eup %3609 }
 0x312   :  { %v2374_v23 = vmul.f32 %v3610_v43, %v4246_v41 }
 0x313   :  { %v2346_v47 = vpop.xlane.xlu1 %2345 }
 0x314   :  { %3613 = vrcp.f32 %v2346_v47  ;;  %v2386_v10 = vpack.c.bf16 %v2374_v23, %v2374_v23 }
 0x316   :  { %2399 = vst.msk [vmem:[#allocation6 + $0xc] sm:$0xf] %vm2395_vm1, %v2386_v10  ;;  %3520 = vmatmul.mubr.msk.bf16.vlgmr.msra.gmra.mxu1 %vm1632_vm2, %v2386_v10 }
 0x317   :  { %3530 = vmatpush3.bf16.msra.mxu1 %v4116_v33  ;;  %3531 = vmatprep.mubr.msk.bf16.mxu1 %vm3701_vm0, %v3700_v0 }
 0x318   :  { %3541 = vmatprep.subr.bf16.mxu1 %v3700_v0 }
 0x319   :  { %v3612_v62 = vpop.eup %3611 }
 0x31a   :  { %v2376_v48 = vmul.f32 %v3612_v62, %v4251_v18 }
 0x31b   :  { %v2352_v49 = vpop.xlane.xlu0 %2351 }
 0x31c   :  { %3615 = vrcp.f32 %v2352_v49  ;;  %v2388_v41 = vpack.c.bf16 %v2376_v48, %v2376_v48 }
 0x31e   :  { %2401 = vst.msk [vmem:[#allocation6 + $0x14] sm:$0xf] %vm2395_vm1, %v2388_v41  ;;  %3532 = vmatmul.mubr.msk.bf16.vlgmr.msra.gmra.mxu1 %vm1632_vm2, %v2388_v41 }
 0x31f   :  { %3542 = vmatpush3.bf16.msra.mxu1 %v4122_v44  ;;  %v2325_v12 = vpop.xlane.xlu0 %2324  ;;  %3543 = vmatprep.mubr.msk.bf16.mxu1 %vm3701_vm0, %v3700_v0 }
 0x320   :  { %3617 = vrcp.f32 %v2325_v12  ;;  %3553 = vmatprep.subr.bf16.mxu1 %v3700_v0 }
 0x321   :  { %v3614_v33 = vpop.eup %3613 }
 0x322   :  { %v2378_v16 = vmul.f32 %v3614_v33, %v4257_v59 }
 0x323   :  { %v2358_v18 = vpop.xlane.xlu1 %2357 }
 0x324   :  { %3619 = vrcp.f32 %v2358_v18  ;;  %v2337_v50 = vpop.xlane.xlu0 %2336  ;;  %v2390_v51 = vpack.c.bf16 %v2378_v16, %v2378_v16 }
 0x325   :  { %3621 = vrcp.f32 %v2337_v50 }
 0x326   :  { %2403 = vst.msk [vmem:[#allocation6 + $0x1c] sm:$0xf] %vm2395_vm1, %v2390_v51  ;;  %3544 = vmatmul.mubr.msk.bf16.vlgmr.msra.gmra.mxu1 %vm1632_vm2, %v2390_v51 }
 0x327   :  { %3554 = vmatpush3.bf16.msra.mxu1 %v4128_v54  ;;  %v2331_v44 = vpop.xlane.xlu1 %2330  ;;  %3555 = vmatprep.mubr.msk.bf16.mxu1 %vm3701_vm0, %v3700_v0 }
 0x328   :  { %3623 = vrcp.f32 %v2331_v44  ;;  %v2349_v53 = vpop.xlane.xlu0 %2348  ;;  %3565 = vmatprep.subr.bf16.mxu1 %v3700_v0 }
 0x329   :  { %v3616_v19 = vpop.eup %3615  ;;  %3625 = vrcp.f32 %v2349_v53 }
 0x32a   :  { %v2380_v58 = vmul.f32 %v3616_v19, %v4265_v31 }
 0x32b   :  { %v2343_v59 = vpop.xlane.xlu1 %2342 }
 0x32c   :  { %v2392_v45 = vpack.c.bf16 %v2380_v58, %v2380_v58  ;;  %3627 = vrcp.f32 %v2343_v59 }
 0x32d   :  { %v3618_v61 = vpop.eup %3617 }
 0x32e   :  { %2405 = vst.msk [vmem:[#allocation6 + $0x24] sm:$0xf] %vm2395_vm1, %v2392_v45  ;;  %3556 = vmatmul.mubr.msk.bf16.vlgmr.msra.gmra.mxu1 %vm1632_vm2, %v2392_v45  ;;  %v2371_v54 = vmul.f32 %v3618_v61, %v4269_v4 }
 0x32f   :  { %3566 = vmatpush3.bf16.msra.mxu1 %v4134_v57  ;;  %v2355_v26 = vpop.xlane.xlu1 %2354  ;;  %3567 = vmatprep.mubr.msk.bf16.mxu1 %vm3701_vm0, %v3700_v0 }
 0x330   :  { %3629 = vrcp.f32 %v2355_v26  ;;  %v2383_v42 = vpack.c.bf16 %v2371_v54, %v2371_v54 }
 0x331   :  { %v3620_v63 = vpop.eup %3619 }
 0x332   :  { %v3622_v46 = vpop.eup %3621  ;;  %v2382_v1 = vmul.f32 %v3620_v63, %v4273_v14  ;;  %2396 = vst.msk [vmem:[#allocation6] sm:$0xf] %vm2395_vm1, %v2383_v42  ;;  %3502 = vmatmul.mubr.msk.bf16.vlgmr.msra.gmra.mxu0 %vm1632_vm2, %v2383_v42 }
 0x333   :  { %3512 = vmatpush3.bf16.msra.mxu0 %v4113_v22  ;;  %3513 = vmatprep.mubr.msk.bf16.mxu0 %vm3701_vm0, %v3700_v0  ;;  %v2375_v57 = vmul.f32 %v3622_v46, %v4275_v17 }
 0x334   :  { %v2394_v55 = vpack.c.bf16 %v2382_v1, %v2382_v1  ;;  %3523 = vmatprep.subr.bf16.mxu0 %v3700_v0 }
 0x335   :  { %v3624_v52 = vpop.eup %3623  ;;  %v2387_v5 = vpack.c.bf16 %v2375_v57, %v2375_v57 }
 0x336   :  { %v3626_v56 = vpop.eup %3625  ;;  %2407 = vst.msk [vmem:[#allocation6 + $0x2c] sm:$0xf] %vm2395_vm1, %v2394_v55  ;;  %3568 = vmatmul.mubr.msk.bf16.vlgmr.msra.gmra.mxu1 %vm1632_vm2, %v2394_v55  ;;  %v2373_v6 = vmul.f32 %v3624_v52, %v4281_v21 }
 0x337   :  { %v2379_v11 = vmul.f32 %v3626_v56, %v4283_v27  ;;  %2400 = vst.msk [vmem:[#allocation6 + $0x10] sm:$0xf] %vm2395_vm1, %v2387_v5 }
 0x338   :  { %v2385_v22 = vpack.c.bf16 %v2373_v6, %v2373_v6 }
 0x339   :  { %v3628_v31 = vpop.eup %3627  ;;  %v2391_v37 = vpack.c.bf16 %v2379_v11, %v2379_v11 }
 0x33a   :  { %2398 = vst.msk [vmem:[#allocation6 + $0x8] sm:$0xf] %vm2395_vm1, %v2385_v22  ;;  %3514 = vmatmul.mubr.msk.bf16.vlgmr.msra.gmra.mxu0 %vm1632_vm2, %v2385_v22  ;;  %v2377_v34 = vmul.f32 %v3628_v31, %v4289_v29 }
 0x33b   :  { %2404 = vst.msk [vmem:[#allocation6 + $0x20] sm:$0xf] %vm2395_vm1, %v2391_v37  ;;  %3524 = vmatpush3.bf16.msra.mxu0 %v4119_v36  ;;  %3525 = vmatprep.mubr.msk.bf16.mxu0 %vm3701_vm0, %v3700_v0 }
 0x33c   :  { %3535 = vmatprep.subr.bf16.mxu0 %v3700_v0  ;;  %v2389_v3 = vpack.c.bf16 %v2377_v34, %v2377_v34 }
 0x33d   :  { %v3630_v4 = vpop.eup %3629 }
 0x33e   :  { %v2381_v13 = vmul.f32 %v3630_v4, %v4293_v32  ;;  %2402 = vst.msk [vmem:[#allocation6 + $0x18] sm:$0xf] %vm2395_vm1, %v2389_v3 }
 0x340   :  { %v2393_v14 = vpack.c.bf16 %v2381_v13, %v2381_v13 }
 0x342   :  { %2406 = vst.msk [vmem:[#allocation6 + $0x28] sm:$0xf] %vm2395_vm1, %v2393_v14  ;;  %3526 = vmatmul.mubr.msk.bf16.vlgmr.msra.gmra.mxu0 %vm1632_vm2, %v2387_v5 }
 0x343   :  { %3536 = vmatpush3.bf16.msra.mxu0 %v4125_v15  ;;  %3537 = vmatprep.mubr.msk.bf16.mxu0 %vm3701_vm0, %v3700_v0 }
 0x344   :  { %3547 = vmatprep.subr.bf16.mxu0 %v3700_v0 }
 0x34a   :  { %3538 = vmatmul.mubr.msk.bf16.vlgmr.msra.gmra.mxu0 %vm1632_vm2, %v2389_v3 }
 0x34b   :  { %3548 = vmatpush3.bf16.msra.mxu0 %v4131_v60  ;;  %3549 = vmatprep.mubr.msk.bf16.mxu0 %vm3701_vm0, %v3700_v0 }
 0x34c   :  { %3559 = vmatprep.subr.bf16.mxu0 %v3700_v0 }
 0x352   :  { %3550 = vmatmul.mubr.msk.bf16.vlgmr.msra.gmra.mxu0 %vm1632_vm2, %v2391_v37 }
 0x353   :  { %3560 = vmatpush3.bf16.msra.mxu0 %v4137_v8  ;;  %3561 = vmatprep.mubr.msk.bf16.mxu0 %vm3701_vm0, %v3700_v0 }
 0x35a   :  { %3562 = vmatmul.mubr.msk.bf16.vlgmr.msra.gmra.mxu0 %vm1632_vm2, %v2393_v14 }
 0x3ce   :  { %v2495_v36 = vpop.f32.mrf.mxu1 }
 0x3cf   :  { %2973 = vrot.lane.b32.xlu0 %v2495_v36, %s3703_s2 }
 0x3d0   :  { %v3509_v15 = vpop.f32.mrf.mxu1 }
 0x3d2   :  { %v2498_v60 = vpop.f32.mrf.mxu1 }
 0x3d4   :  { %v3510_v17 = vpop.f32.mrf.mxu1 }
 0x3d6   :  { %v2587_v2 = vpop.f32.mrf.mxu1 }
 0x3d7   :  { %2975 = vrot.lane.b32.xlu1 %v2587_v2, %s3703_s2 }
 0x3d8   :  { %v3521_v20 = vpop.f32.mrf.mxu1 }
 0x3da   :  { %v2590_v21 = vpop.f32.mrf.mxu1 }
 0x3dc   :  { %v3522_v27 = vpop.f32.mrf.mxu1 }
 0x3de   :  { %v2679_v9 = vpop.f32.mrf.mxu1 }
 0x3df   :  { %2977 = vrot.lane.b32.xlu1 %v2679_v9, %s3703_s2 }
 0x3e0   :  { %v3533_v8 = vpop.f32.mrf.mxu1 }
 0x3e2   :  { %v2682_v0 = vpop.f32.mrf.mxu1 }
 0x3e4   :  { %v3534_v28 = vpop.f32.mrf.mxu1 }
 0x3e6   :  { %v2771_v29 = vpop.f32.mrf.mxu1 }
 0x3e7   :  { %2979 = vrot.lane.b32.xlu1 %v2771_v29, %s3703_s2 }
 0x3e8   :  { %v3545_v30 = vpop.f32.mrf.mxu1 }
 0x3ea   :  { %v2774_v32 = vpop.f32.mrf.mxu1 }
 0x3ec   :  { %v3546_v35 = vpop.f32.mrf.mxu1 }
 0x3ee   :  { %v2863_v7 = vpop.f32.mrf.mxu1 }
 0x3ef   :  { %3662 = shalt.err (!%p3659_p9)
}
 0x3f0   :  { %s3705_s20 = smov 64   ;;  %s3706_s21 = smov 4   ;;  %2981 = vrot.lane.b32.xlu0 %v2863_v7, %s3703_s2  ;;  %v3557_v38 = vpop.f32.mrf.mxu1  ;;  %vm2991_vm0 = vcmask 130112  }
 0x3f1   :  { %3021 = dma.vmem_to_hbm [thread:$0]  %s3016_s18, 768, %s4398_s8, [#allocation7], %s3705_s20, %s3705_s20, %s3706_s21  }
 0x3f2   :  { %v2449_v39 = vpop.f32.mrf.mxu0  ;;  %v2866_v40 = vpop.f32.mrf.mxu1  ;;  %s3707_s8 = smov [#allocation5]  }
 0x3f3   :  { %2961 = vst.msk [vmem:[#allocation5] sm:$0xff] %vm1632_vm2, %v2449_v39  ;;  %s3003_s23 = sshll.u32 %s3707_s8, 4  ;;  %s3004_s23 = int_to_ptr.vmem [resolvable:$true] %s3003_s23 }
 0x3f4   :  { %v3503_v25 = vpop.f32.mrf.mxu0  ;;  %v3558_v24 = vpop.f32.mrf.mxu1  ;;  %s3671_s24 = scalar_lea.vmem %s3004_s23, 768  ;;  %p3676_p11 = scmp.lt.s32.totalorder %s3004_s23, %s3004_s23 }
 0x3f5   :  { %p3672_p10 = scmp.ne.s32.totalorder %s3004_s23, %s3671_s24  ;;  %p3677_p12 = scmp.lt.s32.totalorder %s3671_s24, %s3671_s24 }
 0x3f6   :  { %v2452_v43 = vpop.f32.mrf.mxu0  ;;  %v2955_v23 = vpop.f32.mrf.mxu1 }
 0x3f7   :  { %2983 = vrot.lane.b32.xlu1 %v2955_v23, %s3703_s2  ;;  %p3678_p13 = por %p3677_p12, %p3676_p11 }
 0x3f8   :  { %v3504_v47 = vpop.f32.mrf.mxu0  ;;  %v3569_v10 = vpop.f32.mrf.mxu1 }
 0x3f9   :  { %p3679_p0 = pnand %p3678_p13, %p3672_p10 }
 0x3fa   :  { %v2541_v62 = vpop.f32.mrf.mxu0  ;;  %v2958_v48 = vpop.f32.mrf.mxu1 }
 0x3fb   :  { %2962 = vst.msk [vmem:[#allocation5 + $0x8] sm:$0xff] %vm1632_vm2, %v2541_v62 }
 0x3fc   :  { %v3515_v49 = vpop.f32.mrf.mxu0  ;;  %v3570_v41 = vpop.f32.mrf.mxu1 }
 0x3fe   :  { %v2544_v12 = vpop.f32.mrf.mxu0 }
 0x400   :  { %v3516_v33 = vpop.f32.mrf.mxu0 }
 0x402   :  { %v2633_v16 = vpop.f32.mrf.mxu0 }
 0x403   :  { %2963 = vst.msk [vmem:[#allocation5 + $0x10] sm:$0xff] %vm1632_vm2, %v2633_v16 }
 0x404   :  { %v3527_v18 = vpop.f32.mrf.mxu0 }
 0x406   :  { %v2636_v50 = vpop.f32.mrf.mxu0 }
 0x408   :  { %v3528_v51 = vpop.f32.mrf.mxu0 }
 0x40a   :  { %v2725_v44 = vpop.f32.mrf.mxu0 }
 0x40b   :  { %2964 = vst.msk [vmem:[#allocation5 + $0x18] sm:$0xff] %vm1632_vm2, %v2725_v44 }
 0x40c   :  { %v3539_v53 = vpop.f32.mrf.mxu0 }
 0x40e   :  { %v2728_v19 = vpop.f32.mrf.mxu0 }
 0x410   :  { %v3540_v58 = vpop.f32.mrf.mxu0 }
 0x412   :  { %v2817_v59 = vpop.f32.mrf.mxu0 }
 0x413   :  { %2965 = vst.msk [vmem:[#allocation5 + $0x20] sm:$0xff] %vm1632_vm2, %v2817_v59 }
 0x414   :  { %v3551_v45 = vpop.f32.mrf.mxu0 }
 0x416   :  { %v2820_v61 = vpop.f32.mrf.mxu0 }
 0x418   :  { %v3552_v54 = vpop.f32.mrf.mxu0 }
 0x41a   :  { %v2909_v26 = vpop.f32.mrf.mxu0 }
 0x41b   :  { %2966 = vst.msk [vmem:[#allocation5 + $0x28] sm:$0xff] %vm1632_vm2, %v2909_v26 }
 0x41c   :  { %v3563_v42 = vpop.f32.mrf.mxu0 }
 0x41e   :  { %v2912_v63 = vpop.f32.mrf.mxu0 }
 0x420   :  { %v3564_v46 = vpop.f32.mrf.mxu0 }
 0x441   :  { %v2974_v1 = vpop.permute.xlu0 %2973 }
 0x442   :  { %2992 = vst.msk [vmem:[#allocation5] sm:$0xff] %vm2991_vm0, %v2974_v1 }
 0x449   :  { %v2976_v57 = vpop.permute.xlu1 %2975 }
 0x44a   :  { %2993 = vst.msk [vmem:[#allocation5 + $0x8] sm:$0xff] %vm2991_vm0, %v2976_v57 }
 0x451   :  { %v2978_v55 = vpop.permute.xlu1 %2977 }
 0x452   :  { %2994 = vst.msk [vmem:[#allocation5 + $0x10] sm:$0xff] %vm2991_vm0, %v2978_v55 }
 0x459   :  { %v2980_v52 = vpop.permute.xlu1 %2979 }
 0x45a   :  { %2995 = vst.msk [vmem:[#allocation5 + $0x18] sm:$0xff] %vm2991_vm0, %v2980_v52 }
 0x462   :  { %v2982_v5 = vpop.permute.xlu0 %2981 }
 0x463   :  { %2996 = vst.msk [vmem:[#allocation5 + $0x20] sm:$0xff] %vm2991_vm0, %v2982_v5 }
 0x469   :  { %v2984_v56 = vpop.permute.xlu1 %2983 }
 0x46a   :  { %2997 = vst.msk [vmem:[#allocation5 + $0x28] sm:$0xff] %vm2991_vm0, %v2984_v56 }
 0x46b   :  { %3682 = shalt.err (!%p3679_p0)
}
 0x46c   :  { %s3708_s25 = smov 128  }
 0x46d   :  { %3009 = dma.vmem_to_hbm [thread:$0]  %s3004_s23, 768, %s4397_s7, [#allocation4], %s3708_s25, %s3708_s25, %s3703_s2  }
 0x46e   :  { %3693 = dma.done.wait [#allocation4], 768  }
 0x46f   :  { %3694 = vsyncadd [#allocation4], 4294966528 }
 0x470   :  { %3695 = dma.done.wait [#allocation7], 768  }
 0x471   :  { %3696 = vsyncadd [#allocation7], 4294966528 }
 0x472   :  { %3028 = vsyncpa [#allocation3], 1 }
 0x473   :  { %3029 = vsyncpa [#allocation4], 1 }
 0x474   :  { %3030 = vsyncpa [#allocation7], 1 }

</bundles_post_ra>
